<compile_context>
chip_gen: v7x
topology: tpu7x:2x2x1
jax: 0.10.0
libtpu: 0.0.40
codegen_flags: <defaults>
</compile_context>

<pallas_src>
import functools

import numpy as np
import jax
import jax.numpy as jnp
from jax.experimental import pallas as pl
from jax.experimental.pallas import tpu as pltpu

MAX_LEN = 100
KSIZE = 5
C_IN = 4
C_OUT = 16
CONV_LEN = MAX_LEN - KSIZE + 1          # 96
POOL_LEN = CONV_LEN // 2                # 48
FLAT = C_OUT * POOL_LEN                 # 768
N_CLASSES = 2
N_PAD = 128                             # lane-padded logits width
P_IN = MAX_LEN * C_IN                   # 400  (flattened raw input per sample)
N_CONV = 2 * FLAT                       # 1536 (even|odd pooled-order conv cols)


def dna_cnn_kernel(x_ref, wl_ref, bc_ref, wf_ref, bf_ref, out_ref):
    """One batch tile of TB samples.

    x_ref  : (TB, 400)    bf16  raw input, row index = p*C_IN + c_in
    wl_ref : (400, 1536)  bf16  lowered conv weight, col = s*768 + q*16 + c_out
    bc_ref : (1, 1536)    f32   conv bias broadcast over columns
    wf_ref : (768, 128)   bf16  fc weight in pooled (q-major, c-minor) order, lane-padded
    bf_ref : (1, 128)     f32   fc bias, lane-padded
    out_ref: (TB, 128)    f32   logits (first 2 columns are real)
    """
    # Conv1d(4->16, k=5, valid): ONE small-M, lane-dense MXU matmul.
    y = jnp.dot(x_ref[...], wl_ref[...], preferred_element_type=jnp.float32)
    y = jnp.maximum(y + bc_ref[...], 0.0)                       # bias + ReLU (f32)
    # MaxPool1d(2): even-position half vs odd-position half.  The result is
    # already the flattened (q-major, c-minor) FC input -> no relayout.
    pooled = jnp.maximum(y[:, :FLAT], y[:, FLAT:])              # (TB, 768) f32
    # Linear(768 -> 2), padded to 128 output lanes.
    logits = jnp.dot(pooled.astype(wf_ref.dtype), wf_ref[...],
                     preferred_element_type=jnp.float32)
    out_ref[...] = logits + bf_ref[...]


def _round_up(x, m):
    return ((x + m - 1) // m) * m


def _lowered_conv_weight(w_conv):
    """(C_OUT, C_IN, KSIZE) torch conv weight -> (400, 1536) lowered/Toeplitz matrix.

    Row index = p*C_IN + c_in            (p = input position; matches x.reshape(B, 400))
    Col index = s*768 + q*C_OUT + c_out  (s = even/odd pool slot, q = pool position)
    Entry     = w_conv[c_out, c_in, k]   where p = 2*q + s + k.
    """
    p = np.arange(MAX_LEN)
    k = np.arange(KSIZE)
    t = np.arange(CONV_LEN)
    # Static 0/1 selection tensor: sel[p, k, t] = 1 iff p == t + k.
    sel = jnp.asarray(
        (p[:, None, None] == (t[None, None, :] + k[None, :, None])).astype(np.float32))
    # (p, c_in, t, c_out)
    wl = jnp.einsum("pkt,oik->pito", sel, w_conv.astype(jnp.float32))
    # cols currently t*C_OUT + c_out with t = 2q + s; reorder to s*768 + q*16 + c_out.
    wl = wl.reshape(P_IN, POOL_LEN, 2, C_OUT)
    wl = jnp.transpose(wl, (0, 2, 1, 3)).reshape(P_IN, N_CONV)
    return wl


@functools.partial(jax.jit, static_argnames=("block_batch",))
def simple_dna_cnn(x, w_conv, b_conv, w_fc, b_fc, *, block_batch=256):
    """x: (B, MAX_LEN, C_IN) f32 (the pre-permute PyTorch input layout).
    Weights are in PyTorch layouts:
      w_conv (C_OUT, C_IN, KSIZE), b_conv (C_OUT,),
      w_fc (N_CLASSES, FLAT) with torch's channel-major flatten, b_fc (N_CLASSES,).
    """
    batch = x.shape[0]
    # Sublane-aligned batch tile; for medium/large batches this yields >= 2 grid
    # steps so both v7x TensorCores get work.
    tb = min(block_batch, _round_up(pl.cdiv(batch, 2), 8))
    num_tiles = pl.cdiv(batch, tb)
    bp = num_tiles * tb
    if bp != batch:
        x = jnp.pad(x, ((0, bp - batch), (0, 0), (0, 0)))

    # Raw activations: free contiguous reshape (row = p*C_IN + c_in), bf16 for the MXU.
    x2d = x.reshape(bp, P_IN).astype(jnp.bfloat16)

    # Weight relayouts (tiny, done once by XLA outside the kernel).
    wl = _lowered_conv_weight(w_conv).astype(jnp.bfloat16)               # (400, 1536)
    bc = jnp.tile(b_conv.astype(jnp.float32), 2 * POOL_LEN).reshape(1, N_CONV)
    # torch flatten index = c*POOL_LEN + q ; kernel pooled index = q*C_OUT + c
    wf = jnp.transpose(
        w_fc.reshape(N_CLASSES, C_OUT, POOL_LEN), (2, 1, 0)).reshape(FLAT, N_CLASSES)
    wf = jnp.pad(wf, ((0, 0), (0, N_PAD - N_CLASSES))).astype(jnp.bfloat16)
    bf = jnp.pad(b_fc.astype(jnp.float32), (0, N_PAD - N_CLASSES)).reshape(1, N_PAD)

    flops = bp * (2 * P_IN * N_CONV + 2 * FLAT * N_PAD)
    bytes_accessed = (2 * (x2d.size + wl.size + wf.size)
                      + 4 * (bc.size + bf.size + bp * N_PAD))

    out = pl.pallas_call(
        dna_cnn_kernel,
        out_shape=jax.ShapeDtypeStruct((bp, N_PAD), jnp.float32),
        grid=(num_tiles,),
        in_specs=[
            pl.BlockSpec((tb, P_IN), lambda i: (i, 0)),
            pl.BlockSpec((P_IN, N_CONV), lambda i: (0, 0)),
            pl.BlockSpec((1, N_CONV), lambda i: (0, 0)),
            pl.BlockSpec((FLAT, N_PAD), lambda i: (0, 0)),
            pl.BlockSpec((1, N_PAD), lambda i: (0, 0)),
        ],
        out_specs=pl.BlockSpec((tb, N_PAD), lambda i: (i, 0)),
        compiler_params=pltpu.CompilerParams(
            dimension_semantics=("parallel",)),
        cost_estimate=pl.CostEstimate(
            flops=flops, transcendentals=0, bytes_accessed=bytes_accessed),
    )(x2d, wl, bc, wf, bf)
    return out[:batch, :N_CLASSES]


def reference_forward(x, w_conv, b_conv, w_fc, b_fc):
    """Pure-JAX f32 replica of the PyTorch forward (torch weight layouts)."""
    batch = x.shape[0]
    xt = jnp.transpose(x, (0, 2, 1))                                   # (B, 4, 100)
    conv = jax.lax.conv_general_dilated(
        xt, w_conv, window_strides=(1,), padding="VALID",
        dimension_numbers=("NCH", "OIH", "NCH"))                       # (B, 16, 96)
    conv = jax.nn.relu(conv + b_conv[None, :, None])
    pooled = conv.reshape(batch, C_OUT, POOL_LEN, 2).max(axis=3)        # (B, 16, 48)
    flat = pooled.reshape(batch, FLAT)                                  # torch .view order
    return flat @ w_fc.T + b_fc


if __name__ == "__main__":
    key = jax.random.PRNGKey(0)
    kx, kw1, kb1, kw2, kb2 = jax.random.split(key, 5)
    B = 2
    # Input in the layout the PyTorch module receives: (B, seq_len, 4)
    x = jax.random.normal(kx, (B, MAX_LEN, C_IN), jnp.float32)

    # Deterministic synthetic parameters in PyTorch layouts.
    w_conv = jax.random.normal(kw1, (C_OUT, C_IN, KSIZE), jnp.float32) * 0.2
    b_conv = jax.random.normal(kb1, (C_OUT,), jnp.float32) * 0.1
    w_fc = jax.random.normal(kw2, (N_CLASSES, FLAT), jnp.float32) * 0.05
    b_fc = jax.random.normal(kb2, (N_CLASSES,), jnp.float32) * 0.1

    out = jax.block_until_ready(simple_dna_cnn(x, w_conv, b_conv, w_fc, b_fc))
    ref = reference_forward(x, w_conv, b_conv, w_fc, b_fc)
    assert out.shape == (B, N_CLASSES)
    # bf16 MXU operands (f32 accumulation): allow a bf16-sized tolerance; real
    # layout/index bugs would produce O(1) errors, far above this.
    assert jnp.allclose(out, ref, atol=5e-2, rtol=5e-2), (out, ref)
    print("KERNEL_OK")
</pallas_src>

<mosaic_0001>
module attributes {stable_mosaic.version = 11 : i64} {
  func.func @dna_cnn_kernel(%arg0: i32, %arg1: memref<8x400xbf16, #tpu.memory_space<vmem>>, %arg2: memref<400x1536xbf16, #tpu.memory_space<vmem>>, %arg3: memref<1x1536xf32, #tpu.memory_space<vmem>>, %arg4: memref<768x128xbf16, #tpu.memory_space<vmem>>, %arg5: memref<1x128xf32, #tpu.memory_space<vmem>>, %arg6: memref<8x128xf32, #tpu.memory_space<vmem>>) attributes {dimension_semantics = [#tpu.dimension_semantics<parallel>], iteration_bounds = array<i64: 1>, scalar_prefetch = 0 : i64, scratch_operands = 0 : i64, tpu.core_type = #tpu.core_type<tc>, window_params = [{transform_indices = @transform_0, window_bounds = array<i64: 8, 400>}, {pipeline_mode = #tpu.pipeline_mode<synchronous>, transform_indices = @transform_1, window_bounds = array<i64: 400, 1536>}, {pipeline_mode = #tpu.pipeline_mode<synchronous>, transform_indices = @transform_2, window_bounds = array<i64: 1, 1536>}, {pipeline_mode = #tpu.pipeline_mode<synchronous>, transform_indices = @transform_3, window_bounds = array<i64: 768, 128>}, {pipeline_mode = #tpu.pipeline_mode<synchronous>, transform_indices = @transform_4, window_bounds = array<i64: 1, 128>}, {transform_indices = @transform_5, window_bounds = array<i64: 8, 128>}]} {
    %c0 = arith.constant 0 : index
    %c0_0 = arith.constant 0 : index
    %0 = vector.load %arg1[%c0, %c0_0] : memref<8x400xbf16, #tpu.memory_space<vmem>>, vector<8x400xbf16>
    %c0_1 = arith.constant 0 : index
    %c0_2 = arith.constant 0 : index
    %1 = vector.load %arg2[%c0_1, %c0_2] : memref<400x1536xbf16, #tpu.memory_space<vmem>>, vector<400x1536xbf16>
    %cst = arith.constant dense<0.000000e+00> : vector<8x1536xf32>
    %2 = tpu.matmul %0, %1, %cst {dimension_numbers = #tpu.dot_dimension_numbers<[1], [0], [0], [1], [0, 0, 1, 1], [], []>} : vector<8x400xbf16>, vector<400x1536xbf16>, vector<8x1536xf32> -> vector<8x1536xf32>
    %c0_3 = arith.constant 0 : index
    %c0_4 = arith.constant 0 : index
    %3 = vector.load %arg3[%c0_3, %c0_4] : memref<1x1536xf32, #tpu.memory_space<vmem>>, vector<1x1536xf32>
    %4 = vector.broadcast %3 : vector<1x1536xf32> to vector<8x1536xf32>
    %5 = arith.addf %2, %4 : vector<8x1536xf32>
    %cst_5 = arith.constant 0.000000e+00 : f32
    %6 = vector.broadcast %cst_5 : f32 to vector<8x1536xf32>
    %7 = arith.maximumf %5, %6 : vector<8x1536xf32>
    %8 = vector.extract_strided_slice %7 {offsets = [0, 0], sizes = [8, 768], strides = [1, 1]} : vector<8x1536xf32> to vector<8x768xf32>
    %9 = vector.extract_strided_slice %7 {offsets = [0, 768], sizes = [8, 768], strides = [1, 1]} : vector<8x1536xf32> to vector<8x768xf32>
    %10 = arith.maximumf %8, %9 : vector<8x768xf32>
    %11 = arith.truncf %10 : vector<8x768xf32> to vector<8x768xbf16>
    %c0_6 = arith.constant 0 : index
    %c0_7 = arith.constant 0 : index
    %12 = vector.load %arg4[%c0_6, %c0_7] : memref<768x128xbf16, #tpu.memory_space<vmem>>, vector<768x128xbf16>
    %cst_8 = arith.constant dense<0.000000e+00> : vector<8x128xf32>
    %13 = tpu.matmul %11, %12, %cst_8 {dimension_numbers = #tpu.dot_dimension_numbers<[1], [0], [0], [1], [0, 0, 1, 1], [], []>} : vector<8x768xbf16>, vector<768x128xbf16>, vector<8x128xf32> -> vector<8x128xf32>
    %c0_9 = arith.constant 0 : index
    %c0_10 = arith.constant 0 : index
    %14 = vector.load %arg5[%c0_9, %c0_10] : memref<1x128xf32, #tpu.memory_space<vmem>>, vector<1x128xf32>
    %15 = vector.broadcast %14 : vector<1x128xf32> to vector<8x128xf32>
    %16 = arith.addf %13, %15 : vector<8x128xf32>
    %c0_11 = arith.constant 0 : index
    %c0_12 = arith.constant 0 : index
    %17 = vector.load %arg6[%c0_11, %c0_12] : memref<8x128xf32, #tpu.memory_space<vmem>>, vector<8x128xf32>
    tpu.vector_store %arg6[%c0_11, %c0_12], %16 {strides = array<i32>} : memref<8x128xf32, #tpu.memory_space<vmem>>, vector<8x128xf32>,
    return
  }
  func.func @transform_0(%arg0: i32) -> (i32, i32) {
    %c0_i32 = arith.constant 0 : i32
    %c0_i32_0 = arith.constant 0 : i32
    return %arg0, %c0_i32 : i32, i32
  }
  func.func @transform_1(%arg0: i32) -> (i32, i32) {
    %c0_i32 = arith.constant 0 : i32
    %c0_i32_0 = arith.constant 0 : i32
    %c0_i32_1 = arith.constant 0 : i32
    return %c0_i32, %c0_i32_0 : i32, i32
  }
  func.func @transform_2(%arg0: i32) -> (i32, i32) {
    %c0_i32 = arith.constant 0 : i32
    %c0_i32_0 = arith.constant 0 : i32
    %c0_i32_1 = arith.constant 0 : i32
    return %c0_i32, %c0_i32_0 : i32, i32
  }
  func.func @transform_3(%arg0: i32) -> (i32, i32) {
    %c0_i32 = arith.constant 0 : i32
    %c0_i32_0 = arith.constant 0 : i32
    %c0_i32_1 = arith.constant 0 : i32
    return %c0_i32, %c0_i32_0 : i32, i32
  }
  func.func @transform_4(%arg0: i32) -> (i32, i32) {
    %c0_i32 = arith.constant 0 : i32
    %c0_i32_0 = arith.constant 0 : i32
    %c0_i32_1 = arith.constant 0 : i32
    return %c0_i32, %c0_i32_0 : i32, i32
  }
  func.func @transform_5(%arg0: i32) -> (i32, i32) {
    %c0_i32 = arith.constant 0 : i32
    %c0_i32_0 = arith.constant 0 : i32
    return %arg0, %c0_i32 : i32, i32
  }
}

</mosaic_0001>

<bundles_post_ra>
// kernel: tile.8
= control target key start
LH: loop header
LB: loop body
LE: loop exit
PB: predicated region body
PF: predicated region fallthrough
CT: control target
= control target key end

     0   :  { %s88_s0 = inlined_call_operand.vmem [shape: f32[16], index: 0, kind: input, shape index: {}]   ;;  %s89_s1 = inlined_call_operand.vmem [shape: f32[96,16], index: 1, kind: output, shape index: {}]  }
   0x1   :  { %v4_v0 = vld [vmem:[%s88_s0] ss:$0 sm:$0xff] }
   0x2   :  { %5 = vst [vmem:[%s89_s1] sm:$0xff] %v4_v0  ;;  %28 = vst [vmem:[%s89_s1 + $0x8] sm:$0xff] %v4_v0 }
   0x3   :  { %29 = vst [vmem:[%s89_s1 + $0x10] sm:$0xff] %v4_v0  ;;  %30 = vst [vmem:[%s89_s1 + $0x18] sm:$0xff] %v4_v0 }
   0x4   :  { %31 = vst [vmem:[%s89_s1 + $0x20] sm:$0xff] %v4_v0  ;;  %32 = vst [vmem:[%s89_s1 + $0x28] sm:$0xff] %v4_v0 }
   0x5   :  { %33 = vst [vmem:[%s89_s1 + $0x30] sm:$0xff] %v4_v0  ;;  %34 = vst [vmem:[%s89_s1 + $0x38] sm:$0xff] %v4_v0 }
   0x6   :  { %35 = vst [vmem:[%s89_s1 + $0x40] sm:$0xff] %v4_v0  ;;  %36 = vst [vmem:[%s89_s1 + $0x48] sm:$0xff] %v4_v0 }
   0x7   :  { %37 = vst [vmem:[%s89_s1 + $0x50] sm:$0xff] %v4_v0  ;;  %38 = vst [vmem:[%s89_s1 + $0x58] sm:$0xff] %v4_v0 }

// kernel: tile.9
= control target key start
LH: loop header
LB: loop body
LE: loop exit
PB: predicated region body
PF: predicated region fallthrough
CT: control target
= control target key end

     0   :  { %vm4_vm0 = vcmask 1047556   ;;  %s261_s14 = smov 96   ;;  %s262_s15 = smov 112   ;;  %vm6_vm1 = vcmask 130048   ;;  %vm22_vm2 = vcmask 1048448   ;;  %vm40_vm3 = vcmask 917248   ;;  %s394_s0 = inlined_call_operand.vmem [shape: f32[96,16], index: 0, kind: input, shape index: {}]   ;;  %s395_s1 = inlined_call_operand.vmem [shape: f32[1,1536], index: 1, kind: output, shape index: {}]  }
   0x1   :  { %v225_v0 = vld [vmem:[%s394_s0 + $0x6] ss:$8 sm:$0xf]   ;;  %v222_v2 = vld [vmem:[%s394_s0 + $0x7] ss:$8 sm:$0xf]  }
   0x2   :  { %v226_v1 = vld [vmem:[%s394_s0 + $0x6] ss:$8 sm:$0xf0]   ;;  %v223_v4 = vld [vmem:[%s394_s0 + $0x7] ss:$8 sm:$0xf0]  }
   0x3   :  { %v37_v3 = vsel %vm4_vm0, %v226_v1, %v225_v0  ;;  %v19_v5 = vsel %vm4_vm0, %v223_v4, %v222_v2  ;;  %v227_v6 = vld [vmem:[%s394_s0 + $0x46] ss:$8 sm:$0xf]   ;;  %v224_v7 = vld [vmem:[%s394_s0 + $0x47] ss:$8 sm:$0xf]  }
   0x4   :  { %38 = vrot.lane.b32.xlu1 %v37_v3, %s261_s14  ;;  %20 = vrot.lane.b32.xlu0 %v19_v5, %s262_s15  ;;  %v228_v8 = vld [vmem:[%s394_s0 + $0x5] ss:$8 sm:$0xf]   ;;  %v231_v12 = vld [vmem:[%s394_s0 + $0x4] ss:$8 sm:$0xf]  }
   0x5   :  { %v229_v9 = vld [vmem:[%s394_s0 + $0x5] ss:$8 sm:$0xf0]   ;;  %v232_v13 = vld [vmem:[%s394_s0 + $0x4] ss:$8 sm:$0xf0]  }
   0x6   :  { %v230_v10 = vld [vmem:[%s394_s0 + $0x45] ss:$8 sm:$0xf]   ;;  %v55_v11 = vsel %vm4_vm0, %v229_v9, %v228_v8  ;;  %s263_s30 = smov 80   ;;  %v73_v16 = vsel %vm4_vm0, %v232_v13, %v231_v12  ;;  %s265_s21 = smov 48   ;;  %vm58_vm4 = vcmask 786048  }
   0x7   :  { %v233_v14 = vld [vmem:[%s394_s0 + $0x44] ss:$8 sm:$0xf]   ;;  %v2_v15 = vld [vmem:[%s394_s0] ss:$8 sm:$0xf]  }
   0x8   :  { %45 = vrot.lane.b32.xlu1 %v227_v6, %s261_s14  ;;  %27 = vrot.lane.b32.xlu0 %v224_v7, %s262_s15  ;;  %v3_v17 = vld [vmem:[%s394_s0] ss:$8 sm:$0xf0]   ;;  %v234_v19 = vld [vmem:[%s394_s0 + $0x3] ss:$8 sm:$0xf]  }
   0x9   :  { %v221_v18 = vld [vmem:[%s394_s0 + $0x40] ss:$8 sm:$0xf]   ;;  %v235_v20 = vld [vmem:[%s394_s0 + $0x3] ss:$8 sm:$0xf0]   ;;  %v5_v21 = vsel %vm4_vm0, %v3_v17, %v2_v15 }
   0xa   :  { %13 = vst.msk [vmem:[#allocation0 + $0x40] ss:$8 sm:$0xf] %vm6_vm1, %v221_v18   ;;  %s264_s14 = smov 64   ;;  %v91_v23 = vsel %vm4_vm0, %v235_v20, %v234_v19  ;;  %s266_s28 = smov 32   ;;  %vm76_vm5 = vcmask 654848  }
   0xb   :  { %7 = vst.msk [vmem:[#allocation0] ss:$8 sm:$0xf] %vm6_vm1, %v5_v21   ;;  %8 = vst.msk [vmem:[#allocation0] ss:$8 sm:$0xf0] %vm6_vm1, %v5_v21  }
   0xc   :  { %63 = vrot.lane.b32.xlu1 %v230_v10, %s263_s30  ;;  %56 = vrot.lane.b32.xlu0 %v55_v11, %s263_s30  ;;  %v236_v22 = vld [vmem:[%s394_s0 + $0x43] ss:$8 sm:$0xf]   ;;  %v237_v24 = vld [vmem:[%s394_s0 + $0x2] ss:$8 sm:$0xf]  }
   0xd   :  { %v238_v25 = vld [vmem:[%s394_s0 + $0x2] ss:$8 sm:$0xf0]   ;;  %v240_v28 = vld [vmem:[%s394_s0 + $0x1] ss:$8 sm:$0xf]  }
   0xe   :  { %v239_v26 = vld [vmem:[%s394_s0 + $0x42] ss:$8 sm:$0xf]   ;;  %v109_v27 = vsel %vm4_vm0, %v238_v25, %v237_v24  ;;  %v241_v29 = vld [vmem:[%s394_s0 + $0x1] ss:$8 sm:$0xf0]  }
   0xf   :  { %v242_v30 = vld [vmem:[%s394_s0 + $0x41] ss:$8 sm:$0xf]   ;;  %v127_v31 = vsel %vm4_vm0, %v241_v29, %v240_v28  ;;  %s267_s0 = smov 16   ;;  %vm94_vm6 = vcmask 523648   ;;  %vm112_vm7 = vcmask 392448  }
  0x10   :  { %81 = vrot.lane.b32.xlu1 %v233_v14, %s264_s14  ;;  %74 = vrot.lane.b32.xlu0 %v73_v16, %s264_s14  ;;  %vm130_vm8 = vcmask 261248  }
  0x14   :  { %99 = vrot.lane.b32.xlu1 %v236_v22, %s265_s21  ;;  %92 = vrot.lane.b32.xlu0 %v91_v23, %s265_s21 }
  0x18   :  { %117 = vrot.lane.b32.xlu1 %v239_v26, %s266_s28  ;;  %110 = vrot.lane.b32.xlu0 %v109_v27, %s266_s28 }
  0x1c   :  { %135 = vrot.lane.b32.xlu1 %v242_v30, %s267_s0  ;;  %128 = vrot.lane.b32.xlu0 %v127_v31, %s267_s0 }
  0x76   :  { %v39_v32 = vpop.permute.xlu1 %38   ;;  %v21_v33 = vpop.permute.xlu0 %20  }
  0x77   :  { %23 = vst.msk [vmem:[#allocation0] ss:$8 sm:$0xf] %vm22_vm2, %v21_v33   ;;  %24 = vst.msk [vmem:[#allocation0] ss:$8 sm:$0xf0] %vm22_vm2, %v21_v33  }
  0x78   :  { %41 = vst.msk [vmem:[#allocation0] ss:$8 sm:$0xf] %vm40_vm3, %v39_v32   ;;  %42 = vst.msk [vmem:[#allocation0] ss:$8 sm:$0xf0] %vm40_vm3, %v39_v32  }
  0x7a   :  { %v46_v34 = vpop.permute.xlu1 %45   ;;  %v28_v35 = vpop.permute.xlu0 %27  }
  0x7b   :  { %31 = vst.msk [vmem:[#allocation0 + $0x40] ss:$8 sm:$0xf] %vm22_vm2, %v28_v35  }
  0x7c   :  { %49 = vst.msk [vmem:[#allocation0 + $0x40] ss:$8 sm:$0xf] %vm40_vm3, %v46_v34  }
  0x7e   :  { %v64_v36 = vpop.permute.xlu1 %63   ;;  %v57_v37 = vpop.permute.xlu0 %56  }
  0x7f   :  { %67 = vst.msk [vmem:[#allocation0 + $0x40] ss:$8 sm:$0xf] %vm58_vm4, %v64_v36   ;;  %59 = vst.msk [vmem:[#allocation0] ss:$8 sm:$0xf] %vm58_vm4, %v57_v37  }
  0x80   :  { %60 = vst.msk [vmem:[#allocation0] ss:$8 sm:$0xf0] %vm58_vm4, %v57_v37  }
  0x82   :  { %v82_v38 = vpop.permute.xlu1 %81   ;;  %v75_v39 = vpop.permute.xlu0 %74  }
  0x83   :  { %85 = vst.msk [vmem:[#allocation0 + $0x40] ss:$8 sm:$0xf] %vm76_vm5, %v82_v38   ;;  %77 = vst.msk [vmem:[#allocation0] ss:$8 sm:$0xf] %vm76_vm5, %v75_v39  }
  0x84   :  { %78 = vst.msk [vmem:[#allocation0] ss:$8 sm:$0xf0] %vm76_vm5, %v75_v39  }
  0x86   :  { %v100_v40 = vpop.permute.xlu1 %99   ;;  %v93_v41 = vpop.permute.xlu0 %92  }
  0x87   :  { %103 = vst.msk [vmem:[#allocation0 + $0x40] ss:$8 sm:$0xf] %vm94_vm6, %v100_v40   ;;  %95 = vst.msk [vmem:[#allocation0] ss:$8 sm:$0xf] %vm94_vm6, %v93_v41  }
  0x88   :  { %96 = vst.msk [vmem:[#allocation0] ss:$8 sm:$0xf0] %vm94_vm6, %v93_v41  }
  0x8a   :  { %v118_v42 = vpop.permute.xlu1 %117   ;;  %v111_v43 = vpop.permute.xlu0 %110  }
  0x8b   :  { %121 = vst.msk [vmem:[#allocation0 + $0x40] ss:$8 sm:$0xf] %vm112_vm7, %v118_v42   ;;  %113 = vst.msk [vmem:[#allocation0] ss:$8 sm:$0xf] %vm112_vm7, %v111_v43  }
  0x8c   :  { %114 = vst.msk [vmem:[#allocation0] ss:$8 sm:$0xf0] %vm112_vm7, %v111_v43  }
  0x8e   :  { %v136_v44 = vpop.permute.xlu1 %135   ;;  %v129_v45 = vpop.permute.xlu0 %128  }
  0x8f   :  { %139 = vst.msk [vmem:[#allocation0 + $0x40] ss:$8 sm:$0xf] %vm130_vm8, %v136_v44   ;;  %131 = vst.msk [vmem:[#allocation0] ss:$8 sm:$0xf] %vm130_vm8, %v129_v45  }
  0x90   :  { %132 = vst.msk [vmem:[#allocation0] ss:$8 sm:$0xf0] %vm130_vm8, %v129_v45  }
  0x96   :  { %v188_v46 = vld [vmem:[#allocation0 + $0x40] sm:$0x1]  ;;  %v194_v47 = vld [vmem:[#allocation0 + $0x48] sm:$0x1]  ;;  %v200_v48 = vld [vmem:[#allocation0 + $0x50] sm:$0x1] }
  0x97   :  { %250 = vst [vmem:[%s395_s1 + $0x8] sm:$0x1] %v188_v46  ;;  %251 = vst [vmem:[%s395_s1 + $0x9] sm:$0x1] %v194_v47  ;;  %v206_v49 = vld [vmem:[#allocation0 + $0x58] sm:$0x1] }
  0x98   :  { %252 = vst [vmem:[%s395_s1 + $0xa] sm:$0x1] %v200_v48  ;;  %v143_v50 = vld [vmem:[#allocation0] sm:$0x1]  ;;  %v147_v51 = vld [vmem:[#allocation0 + $0x8] sm:$0x1] }
  0x99   :  { %253 = vst [vmem:[%s395_s1 + $0xb] sm:$0x1] %v206_v49  ;;  %145 = vst [vmem:[%s395_s1] sm:$0x1] %v143_v50  ;;  %v152_v52 = vld [vmem:[#allocation0 + $0x10] sm:$0x1] }
  0x9a   :  { %243 = vst [vmem:[%s395_s1 + $0x1] sm:$0x1] %v147_v51  ;;  %v158_v53 = vld [vmem:[#allocation0 + $0x18] sm:$0x1]  ;;  %v164_v54 = vld [vmem:[#allocation0 + $0x20] sm:$0x1] }
  0x9b   :  { %244 = vst [vmem:[%s395_s1 + $0x2] sm:$0x1] %v152_v52  ;;  %245 = vst [vmem:[%s395_s1 + $0x3] sm:$0x1] %v158_v53  ;;  %v170_v55 = vld [vmem:[#allocation0 + $0x28] sm:$0x1] }
  0x9c   :  { %246 = vst [vmem:[%s395_s1 + $0x4] sm:$0x1] %v164_v54  ;;  %v176_v56 = vld [vmem:[#allocation0 + $0x30] sm:$0x1]  ;;  %v182_v57 = vld [vmem:[#allocation0 + $0x38] sm:$0x1] }
  0x9d   :  { %247 = vst [vmem:[%s395_s1 + $0x5] sm:$0x1] %v170_v55  ;;  %248 = vst [vmem:[%s395_s1 + $0x6] sm:$0x1] %v176_v56 }
  0x9e   :  { %249 = vst [vmem:[%s395_s1 + $0x7] sm:$0x1] %v182_v57 }

// kernel: simple_dna_cnn.1
= control target key start
LH: loop header
LB: loop body
LE: loop exit
PB: predicated region body
PF: predicated region fallthrough
CT: control target
= control target key end

     0   :  { %vm1900_vm0 = vcmask 130048   ;;  %s5075_s1 = inlined_call_operand.vmem [shape: bf16[400,1536], index: 1, kind: input, shape index: {}]   ;;  %s5076_s0 = inlined_call_operand.vmem [shape: bf16[8,400], index: 0, kind: input, shape index: {}]   ;;  %s5077_s3 = inlined_call_operand.vmem [shape: bf16[768,128], index: 3, kind: input, shape index: {}]   ;;  %s5078_s2 = inlined_call_operand.vmem [shape: f32[1,1536], index: 2, kind: input, shape index: {}]   ;;  %s5079_s4 = inlined_call_operand.vmem [shape: f32[1,128], index: 4, kind: input, shape index: {}]   ;;  %s5080_s5 = inlined_call_operand.vmem [shape: f32[8,128], index: 5, kind: output, shape index: {}]  }
   0x1   :  { %v3397_v0 = vld [vmem:[%s5075_s1 + $0x4] ss:$48 sps:$4 sm:$0xff]   ;;  %v3399_v1 = vld [vmem:[%s5075_s1 + $0xc] ss:$48 sps:$4 sm:$0xff]   ;;  %v3401_v2 = vld [vmem:[%s5075_s1] ss:$48 sps:$4 sm:$0xff]  }
   0x2   :  { %1904 = vmatprep.subr.bf16.mxu0 %v3397_v0  ;;  %v3402_v3 = vld [vmem:[%s5075_s1 + $0x8] ss:$48 sps:$4 sm:$0xff]   ;;  %1986 = vmatprep.subr.bf16.mxu1 %v3399_v1  ;;  %v3403_v4 = vld [vmem:[%s5075_s1 + $0x64] ss:$48 sps:$4 sm:$0xff]   ;;  %v3405_v5 = vld [vmem:[%s5075_s1 + $0x6c] ss:$48 sps:$4 sm:$0xff]  }
   0x3   :  { %1905 = vmatpush1.bf16.msra.mxu0 %v3401_v2  ;;  %1987 = vmatpush1.bf16.msra.mxu1 %v3402_v3  ;;  %v3407_v6 = vld [vmem:[%s5075_s1 + $0x60] ss:$48 sps:$4 sm:$0xff]   ;;  %v3408_v7 = vld [vmem:[%s5075_s1 + $0x68] ss:$48 sps:$4 sm:$0xff]   ;;  %v3409_v8 = vld [vmem:[%s5075_s1 + $0xc4] ss:$48 sps:$4 sm:$0xff]  }
   0x4   :  { %1906 = vmatprep.subr.bf16.mxu0 %v3403_v4  ;;  %1988 = vmatprep.subr.bf16.mxu1 %v3405_v5  ;;  %v3411_v9 = vld [vmem:[%s5075_s1 + $0xcc] ss:$48 sps:$4 sm:$0xff]   ;;  %v3413_v10 = vld [vmem:[%s5075_s1 + $0xc0] ss:$48 sps:$4 sm:$0xff]   ;;  %v3414_v11 = vld [vmem:[%s5075_s1 + $0xc8] ss:$48 sps:$4 sm:$0xff]  }
   0x5   :  { %v3415_v12 = vld [vmem:[%s5075_s1 + $0x124] ss:$48 sps:$4 sm:$0xff]   ;;  %v3417_v13 = vld [vmem:[%s5075_s1 + $0x12c] ss:$48 sps:$4 sm:$0xff]   ;;  %v3419_v14 = vld [vmem:[%s5075_s1 + $0x120] ss:$48 sps:$4 sm:$0xff]  }
   0x6   :  { %v3420_v15 = vld [vmem:[%s5075_s1 + $0x128] ss:$48 sps:$4 sm:$0xff]   ;;  %v3421_v16 = vld [vmem:[%s5075_s1 + $0x184] ss:$48 sps:$4 sm:$0xff]   ;;  %v3423_v17 = vld [vmem:[%s5075_s1 + $0x18c] ss:$48 sps:$4 sm:$0xff]  }
   0x7   :  { %1907 = vmatpush1.bf16.msra.mxu0 %v3407_v6  ;;  %1989 = vmatpush1.bf16.msra.mxu1 %v3408_v7  ;;  %v3425_v18 = vld [vmem:[%s5075_s1 + $0x180] ss:$48 sps:$4 sm:$0xff]   ;;  %v3426_v19 = vld [vmem:[%s5075_s1 + $0x188] ss:$48 sps:$4 sm:$0xff]   ;;  %v3427_v20 = vld [vmem:[%s5075_s1 + $0x1e4] ss:$48 sps:$4 sm:$0xff]  }
   0x8   :  { %1908 = vmatprep.subr.bf16.mxu0 %v3409_v8  ;;  %1990 = vmatprep.subr.bf16.mxu1 %v3411_v9  ;;  %v3429_v21 = vld [vmem:[%s5075_s1 + $0x1ec] ss:$48 sps:$4 sm:$0xff]   ;;  %v3431_v22 = vld [vmem:[%s5075_s1 + $0x1e0] ss:$48 sps:$4 sm:$0xff]   ;;  %v3432_v23 = vld [vmem:[%s5075_s1 + $0x1e8] ss:$48 sps:$4 sm:$0xff]  }
   0x9   :  { %v3433_v24 = vld [vmem:[%s5075_s1 + $0x244] ss:$48 sps:$4 sm:$0xff]   ;;  %v3435_v25 = vld [vmem:[%s5075_s1 + $0x24c] ss:$48 sps:$4 sm:$0xff]   ;;  %v3437_v26 = vld [vmem:[%s5075_s1 + $0x240] ss:$48 sps:$4 sm:$0xff]  }
   0xa   :  { %v3438_v27 = vld [vmem:[%s5075_s1 + $0x248] ss:$48 sps:$4 sm:$0xff]   ;;  %v3439_v28 = vld [vmem:[%s5075_s1 + $0x2a4] ss:$48 sps:$4 sm:$0xff]   ;;  %v3441_v29 = vld [vmem:[%s5075_s1 + $0x2ac] ss:$48 sps:$4 sm:$0xff]  }
   0xb   :  { %1909 = vmatpush1.bf16.msra.mxu0 %v3413_v10  ;;  %1991 = vmatpush1.bf16.msra.mxu1 %v3414_v11  ;;  %v3443_v30 = vld [vmem:[%s5075_s1 + $0x2a0] ss:$48 sps:$4 sm:$0xff]   ;;  %v3444_v31 = vld [vmem:[%s5075_s1 + $0x2a8] ss:$48 sps:$4 sm:$0xff]   ;;  %v3445_v32 = vld [vmem:[%s5075_s1 + $0x304] ss:$48 sps:$4 sm:$0xff]  }
   0xc   :  { %1910 = vmatprep.subr.bf16.mxu0 %v3415_v12  ;;  %1992 = vmatprep.subr.bf16.mxu1 %v3417_v13  ;;  %v3447_v33 = vld [vmem:[%s5075_s1 + $0x30c] ss:$48 sps:$4 sm:$0xff]   ;;  %v3449_v34 = vld [vmem:[%s5075_s1 + $0x300] ss:$48 sps:$4 sm:$0xff]   ;;  %v3450_v35 = vld [vmem:[%s5075_s1 + $0x308] ss:$48 sps:$4 sm:$0xff]  }
   0xd   :  { %v3451_v36 = vld [vmem:[%s5075_s1 + $0x364] ss:$48 sps:$4 sm:$0xff]   ;;  %v3453_v37 = vld [vmem:[%s5075_s1 + $0x36c] ss:$48 sps:$4 sm:$0xff]   ;;  %v3455_v38 = vld [vmem:[%s5075_s1 + $0x360] ss:$48 sps:$4 sm:$0xff]  }
   0xe   :  { %v3456_v39 = vld [vmem:[%s5075_s1 + $0x368] ss:$48 sps:$4 sm:$0xff]   ;;  %v3457_v40 = vld [vmem:[%s5075_s1 + $0x3c4] ss:$48 sps:$4 sm:$0xff]   ;;  %v3459_v41 = vld [vmem:[%s5075_s1 + $0x3cc] ss:$48 sps:$4 sm:$0xff]  }
   0xf   :  { %1911 = vmatpush1.bf16.msra.mxu0 %v3419_v14  ;;  %1993 = vmatpush1.bf16.msra.mxu1 %v3420_v15  ;;  %v3461_v42 = vld [vmem:[%s5075_s1 + $0x3c0] ss:$48 sps:$4 sm:$0xff]   ;;  %v3462_v43 = vld [vmem:[%s5075_s1 + $0x3c8] ss:$48 sps:$4 sm:$0xff]   ;;  %v3463_v44 = vld [vmem:[%s5075_s1 + $0x424] ss:$48 sps:$4 sm:$0xff]  }
  0x10   :  { %1912 = vmatprep.subr.bf16.mxu0 %v3421_v16  ;;  %1994 = vmatprep.subr.bf16.mxu1 %v3423_v17  ;;  %v3465_v45 = vld [vmem:[%s5075_s1 + $0x42c] ss:$48 sps:$4 sm:$0xff]   ;;  %v21_v46 = vld [vmem:[%s5076_s0] sm:$0xff]  ;;  %v3468_v49 = vld [vmem:[%s5075_s1 + $0x428] ss:$48 sps:$4 sm:$0xff]  }
  0x11   :  { %v3467_v47 = vld [vmem:[%s5075_s1 + $0x420] ss:$48 sps:$4 sm:$0xff]   ;;  %v4073_v48 = vcombine.high %v21_v46, %v21_v46  ;;  %v3469_v50 = vld [vmem:[%s5075_s1 + $0x484] ss:$48 sps:$4 sm:$0xff]   ;;  %v3471_v51 = vld [vmem:[%s5075_s1 + $0x48c] ss:$48 sps:$4 sm:$0xff]   ;;  %v4137_v5 = vcombine.low %v21_v46, %v21_v46 }
  0x12   :  { %v3473_v52 = vld [vmem:[%s5075_s1 + $0x480] ss:$48 sps:$4 sm:$0xff]   ;;  %v3474_v53 = vld [vmem:[%s5075_s1 + $0x488] ss:$48 sps:$4 sm:$0xff]   ;;  %v3475_v54 = vld [vmem:[%s5075_s1 + $0x4e4] ss:$48 sps:$4 sm:$0xff]  }
  0x13   :  { %1913 = vmatpush1.bf16.msra.mxu0 %v3425_v18  ;;  %1995 = vmatpush1.bf16.msra.mxu1 %v3426_v19  ;;  %v3477_v55 = vld [vmem:[%s5075_s1 + $0x4ec] ss:$48 sps:$4 sm:$0xff]   ;;  %v3479_v56 = vld [vmem:[%s5075_s1 + $0x4e0] ss:$48 sps:$4 sm:$0xff]   ;;  %v3480_v57 = vld [vmem:[%s5075_s1 + $0x4e8] ss:$48 sps:$4 sm:$0xff]  }
  0x14   :  { %1914 = vmatprep.subr.bf16.mxu0 %v3427_v20  ;;  %1996 = vmatprep.subr.bf16.mxu1 %v3429_v21  ;;  %v3481_v58 = vld [vmem:[%s5075_s1 + $0x544] ss:$48 sps:$4 sm:$0xff]   ;;  %v3483_v59 = vld [vmem:[%s5075_s1 + $0x54c] ss:$48 sps:$4 sm:$0xff]   ;;  %v3485_v60 = vld [vmem:[%s5075_s1 + $0x540] ss:$48 sps:$4 sm:$0xff]  }
  0x15   :  { %1936 = vmatprep.mubr.bf16.mxu0 %v4073_v48  ;;  %2018 = vmatprep.mubr.bf16.mxu1 %v4073_v48  ;;  %v3486_v61 = vld [vmem:[%s5075_s1 + $0x548] ss:$48 sps:$4 sm:$0xff]   ;;  %v3487_v62 = vld [vmem:[%s5075_s1 + $0x5a4] ss:$48 sps:$4 sm:$0xff]   ;;  %v3489_v63 = vld [vmem:[%s5075_s1 + $0x5ac] ss:$48 sps:$4 sm:$0xff]  }
  0x16   :  { %v3491_v0 = vld [vmem:[%s5075_s1 + $0x5a0] ss:$48 sps:$4 sm:$0xff]   ;;  %v3492_v1 = vld [vmem:[%s5075_s1 + $0x5a8] ss:$48 sps:$4 sm:$0xff]   ;;  %v3496_v2 = vld [vmem:[%s5075_s1 + $0x604] ss:$48 sps:$4 sm:$0xff]  }
  0x17   :  { %1915 = vmatpush1.bf16.msra.mxu0 %v3431_v22  ;;  %1997 = vmatpush1.bf16.msra.mxu1 %v3432_v23  ;;  %v3499_v3 = vld [vmem:[%s5075_s1 + $0x60c] ss:$48 sps:$4 sm:$0xff]   ;;  %v3494_v4 = vld [vmem:[%s5075_s1 + $0x600] ss:$48 sps:$4 sm:$0xff]   ;;  %v3497_v6 = vld [vmem:[%s5075_s1 + $0x608] ss:$48 sps:$4 sm:$0xff]  }
  0x18   :  { %1916 = vmatprep.subr.bf16.mxu0 %v3433_v24  ;;  %1998 = vmatprep.subr.bf16.mxu1 %v3435_v25  ;;  %v3503_v7 = vld [vmem:[%s5075_s1 + $0x664] ss:$48 sps:$4 sm:$0xff]   ;;  %v3506_v8 = vld [vmem:[%s5075_s1 + $0x66c] ss:$48 sps:$4 sm:$0xff]   ;;  %v3501_v10 = vld [vmem:[%s5075_s1 + $0x660] ss:$48 sps:$4 sm:$0xff]  }
  0x19   :  { %v4153_v9 = vld [vmem:[%s5076_s0 + $0x8] sm:$0xff]  ;;  %v3509_v13 = vld [vmem:[%s5075_s1 + $0x6c4] ss:$48 sps:$4 sm:$0xff]   ;;  %v3507_v15 = vld [vmem:[%s5075_s1 + $0x6c0] ss:$48 sps:$4 sm:$0xff]  }
  0x1a   :  { %v3504_v11 = vld [vmem:[%s5075_s1 + $0x668] ss:$48 sps:$4 sm:$0xff]   ;;  %v4163_v12 = vcombine.high %v4153_v9, %v4153_v9  ;;  %v3512_v14 = vld [vmem:[%s5075_s1 + $0x6cc] ss:$48 sps:$4 sm:$0xff]   ;;  %v3515_v17 = vld [vmem:[%s5075_s1 + $0x724] ss:$48 sps:$4 sm:$0xff]  }
  0x1b   :  { %1917 = vmatpush1.bf16.msra.mxu0 %v3437_v26  ;;  %1999 = vmatpush1.bf16.msra.mxu1 %v3438_v27  ;;  %v3510_v16 = vld [vmem:[%s5075_s1 + $0x6c8] ss:$48 sps:$4 sm:$0xff]   ;;  %v3518_v18 = vld [vmem:[%s5075_s1 + $0x72c] ss:$48 sps:$4 sm:$0xff]   ;;  %v3513_v19 = vld [vmem:[%s5075_s1 + $0x720] ss:$48 sps:$4 sm:$0xff]  }
  0x1c   :  { %1918 = vmatprep.subr.bf16.mxu0 %v3439_v28  ;;  %2000 = vmatprep.subr.bf16.mxu1 %v3441_v29  ;;  %v3516_v20 = vld [vmem:[%s5075_s1 + $0x728] ss:$48 sps:$4 sm:$0xff]   ;;  %v3521_v21 = vld [vmem:[%s5075_s1 + $0x784] ss:$48 sps:$4 sm:$0xff]   ;;  %v3524_v22 = vld [vmem:[%s5075_s1 + $0x78c] ss:$48 sps:$4 sm:$0xff]  }
  0x1d   :  { %v3519_v23 = vld [vmem:[%s5075_s1 + $0x780] ss:$48 sps:$4 sm:$0xff]   ;;  %v3522_v24 = vld [vmem:[%s5075_s1 + $0x788] ss:$48 sps:$4 sm:$0xff]   ;;  %v3527_v25 = vld [vmem:[%s5075_s1 + $0x7e4] ss:$48 sps:$4 sm:$0xff]  }
  0x1e   :  { %v3530_v26 = vld [vmem:[%s5075_s1 + $0x7ec] ss:$48 sps:$4 sm:$0xff]   ;;  %v3525_v27 = vld [vmem:[%s5075_s1 + $0x7e0] ss:$48 sps:$4 sm:$0xff]   ;;  %v3528_v28 = vld [vmem:[%s5075_s1 + $0x7e8] ss:$48 sps:$4 sm:$0xff]  }
  0x1f   :  { %1919 = vmatpush1.bf16.msra.mxu0 %v3443_v30  ;;  %2001 = vmatpush1.bf16.msra.mxu1 %v3444_v31  ;;  %v3533_v29 = vld [vmem:[%s5075_s1 + $0x844] ss:$48 sps:$4 sm:$0xff]   ;;  %v3536_v30 = vld [vmem:[%s5075_s1 + $0x84c] ss:$48 sps:$4 sm:$0xff]   ;;  %v3531_v31 = vld [vmem:[%s5075_s1 + $0x840] ss:$48 sps:$4 sm:$0xff]  }
  0x20   :  { %1920 = vmatprep.subr.bf16.mxu0 %v3445_v32  ;;  %2002 = vmatprep.subr.bf16.mxu1 %v3447_v33  ;;  %v3534_v32 = vld [vmem:[%s5075_s1 + $0x848] ss:$48 sps:$4 sm:$0xff]   ;;  %v3539_v33 = vld [vmem:[%s5075_s1 + $0x8a4] ss:$48 sps:$4 sm:$0xff]  }
  0x21   :  { %v3559_v46 = vld [vmem:[%s5075_s1 + $0x74] ss:$48 sps:$4 sm:$0xff]  }
  0x23   :  { %1921 = vmatpush1.bf16.msra.mxu0 %v3449_v34  ;;  %2003 = vmatpush1.bf16.msra.mxu1 %v3450_v35  ;;  %v3542_v34 = vld [vmem:[%s5075_s1 + $0x8ac] ss:$48 sps:$4 sm:$0xff]   ;;  %v3537_v35 = vld [vmem:[%s5075_s1 + $0x8a0] ss:$48 sps:$4 sm:$0xff]  }
  0x24   :  { %1922 = vmatprep.subr.bf16.mxu0 %v3451_v36  ;;  %2004 = vmatprep.subr.bf16.mxu1 %v3453_v37  ;;  %v3540_v36 = vld [vmem:[%s5075_s1 + $0x8a8] ss:$48 sps:$4 sm:$0xff]   ;;  %v3545_v37 = vld [vmem:[%s5075_s1 + $0x904] ss:$48 sps:$4 sm:$0xff]  }
  0x27   :  { %1923 = vmatpush1.bf16.msra.mxu0 %v3455_v38  ;;  %2005 = vmatpush1.bf16.msra.mxu1 %v3456_v39  ;;  %v3548_v38 = vld [vmem:[%s5075_s1 + $0x90c] ss:$48 sps:$4 sm:$0xff]   ;;  %v3543_v39 = vld [vmem:[%s5075_s1 + $0x900] ss:$48 sps:$4 sm:$0xff]  }
  0x28   :  { %1924 = vmatprep.subr.bf16.mxu0 %v3457_v40  ;;  %2006 = vmatprep.subr.bf16.mxu1 %v3459_v41  ;;  %v3546_v40 = vld [vmem:[%s5075_s1 + $0x908] ss:$48 sps:$4 sm:$0xff]   ;;  %v3553_v41 = vld [vmem:[%s5075_s1 + $0x14] ss:$48 sps:$4 sm:$0xff]  }
  0x2b   :  { %1925 = vmatpush1.bf16.msra.mxu0 %v3461_v42  ;;  %2007 = vmatpush1.bf16.msra.mxu1 %v3462_v43  ;;  %v3556_v42 = vld [vmem:[%s5075_s1 + $0x1c] ss:$48 sps:$4 sm:$0xff]   ;;  %v4261_v43 = vcombine.low %v4153_v9, %v4153_v9 }
  0x2c   :  { %1926 = vmatprep.subr.bf16.mxu0 %v3463_v44  ;;  %2008 = vmatprep.subr.bf16.mxu1 %v3465_v45  ;;  %v3551_v44 = vld [vmem:[%s5075_s1 + $0x10] ss:$48 sps:$4 sm:$0xff]   ;;  %v3554_v45 = vld [vmem:[%s5075_s1 + $0x18] ss:$48 sps:$4 sm:$0xff]   ;;  %v3598_v9 = vld [vmem:[%s5075_s1 + $0x2bc] ss:$48 sps:$4 sm:$0xff]  }
  0x2f   :  { %1927 = vmatpush1.bf16.msra.mxu0 %v3467_v47  ;;  %2009 = vmatpush1.bf16.msra.mxu1 %v3468_v49  ;;  %v3562_v47 = vld [vmem:[%s5075_s1 + $0x7c] ss:$48 sps:$4 sm:$0xff]   ;;  %v3557_v49 = vld [vmem:[%s5075_s1 + $0x70] ss:$48 sps:$4 sm:$0xff]  }
  0x30   :  { %1928 = vmatprep.subr.bf16.mxu0 %v3469_v50  ;;  %2010 = vmatprep.subr.bf16.mxu1 %v3471_v51  ;;  %v3560_v50 = vld [vmem:[%s5075_s1 + $0x78] ss:$48 sps:$4 sm:$0xff]   ;;  %v3565_v51 = vld [vmem:[%s5075_s1 + $0xd4] ss:$48 sps:$4 sm:$0xff]  }
  0x33   :  { %1929 = vmatpush1.bf16.msra.mxu0 %v3473_v52  ;;  %2011 = vmatpush1.bf16.msra.mxu1 %v3474_v53  ;;  %v3568_v52 = vld [vmem:[%s5075_s1 + $0xdc] ss:$48 sps:$4 sm:$0xff]   ;;  %v3563_v53 = vld [vmem:[%s5075_s1 + $0xd0] ss:$48 sps:$4 sm:$0xff]  }
  0x34   :  { %1930 = vmatprep.subr.bf16.mxu0 %v3475_v54  ;;  %2012 = vmatprep.subr.bf16.mxu1 %v3477_v55  ;;  %v3566_v54 = vld [vmem:[%s5075_s1 + $0xd8] ss:$48 sps:$4 sm:$0xff]   ;;  %v3571_v55 = vld [vmem:[%s5075_s1 + $0x134] ss:$48 sps:$4 sm:$0xff]  }
  0x37   :  { %1931 = vmatpush1.bf16.msra.mxu0 %v3479_v56  ;;  %2013 = vmatpush1.bf16.msra.mxu1 %v3480_v57  ;;  %v3574_v56 = vld [vmem:[%s5075_s1 + $0x13c] ss:$48 sps:$4 sm:$0xff]   ;;  %v3569_v57 = vld [vmem:[%s5075_s1 + $0x130] ss:$48 sps:$4 sm:$0xff]  }
  0x38   :  { %1932 = vmatprep.subr.bf16.mxu0 %v3481_v58  ;;  %2014 = vmatprep.subr.bf16.mxu1 %v3483_v59  ;;  %v3572_v58 = vld [vmem:[%s5075_s1 + $0x138] ss:$48 sps:$4 sm:$0xff]   ;;  %v3577_v59 = vld [vmem:[%s5075_s1 + $0x194] ss:$48 sps:$4 sm:$0xff]  }
  0x3b   :  { %1933 = vmatpush1.bf16.msra.mxu0 %v3485_v60  ;;  %2015 = vmatpush1.bf16.msra.mxu1 %v3486_v61  ;;  %v3580_v60 = vld [vmem:[%s5075_s1 + $0x19c] ss:$48 sps:$4 sm:$0xff]   ;;  %v3575_v61 = vld [vmem:[%s5075_s1 + $0x190] ss:$48 sps:$4 sm:$0xff]  }
  0x3c   :  { %1934 = vmatprep.subr.bf16.mxu0 %v3487_v62  ;;  %2016 = vmatprep.subr.bf16.mxu1 %v3489_v63  ;;  %v3578_v62 = vld [vmem:[%s5075_s1 + $0x198] ss:$48 sps:$4 sm:$0xff]   ;;  %v3583_v63 = vld [vmem:[%s5075_s1 + $0x1f4] ss:$48 sps:$4 sm:$0xff]  }
  0x3f   :  { %1935 = vmatpush1.bf16.msra.mxu0 %v3491_v0  ;;  %2017 = vmatpush1.bf16.msra.mxu1 %v3492_v1  ;;  %v3586_v0 = vld [vmem:[%s5075_s1 + $0x1fc] ss:$48 sps:$4 sm:$0xff]   ;;  %v3581_v1 = vld [vmem:[%s5075_s1 + $0x1f0] ss:$48 sps:$4 sm:$0xff]  }
  0x40   :  { %1945 = vmatprep.subr.bf16.mxu0 %v3496_v2  ;;  %2027 = vmatprep.subr.bf16.mxu1 %v3499_v3  ;;  %v3584_v2 = vld [vmem:[%s5075_s1 + $0x1f8] ss:$48 sps:$4 sm:$0xff]   ;;  %v3589_v3 = vld [vmem:[%s5075_s1 + $0x254] ss:$48 sps:$4 sm:$0xff]  }
  0x42   :  { %1937 = vmatmul.mubr.bf16.vlgmr.msra.gmra.mrb[0].mxu0 %v4137_v5  ;;  %2019 = vmatmul.mubr.bf16.vlgmr.msra.gmra.mrb[0].mxu1 %v4137_v5 }
  0x43   :  { %1946 = vmatpush1.bf16.msra.mxu0 %v3494_v4  ;;  %2028 = vmatpush1.bf16.msra.mxu1 %v3497_v6  ;;  %v3592_v4 = vld [vmem:[%s5075_s1 + $0x25c] ss:$48 sps:$4 sm:$0xff]   ;;  %v3587_v6 = vld [vmem:[%s5075_s1 + $0x250] ss:$48 sps:$4 sm:$0xff]  }
  0x44   :  { %1947 = vmatprep.subr.bf16.mxu0 %v3503_v7  ;;  %2029 = vmatprep.subr.bf16.mxu1 %v3506_v8  ;;  %v3590_v7 = vld [vmem:[%s5075_s1 + $0x258] ss:$48 sps:$4 sm:$0xff]   ;;  %v3595_v8 = vld [vmem:[%s5075_s1 + $0x2b4] ss:$48 sps:$4 sm:$0xff]  }
  0x45   :  { %3240 = vmatprep.mubr.msk.bf16.mxu0 %vm1900_vm0, %v4163_v12  ;;  %3241 = vmatprep.mubr.msk.bf16.mxu1 %vm1900_vm0, %v4163_v12 }
  0x47   :  { %1948 = vmatpush1.bf16.msra.mxu0 %v3501_v10  ;;  %2030 = vmatpush1.bf16.msra.mxu1 %v3504_v11  ;;  %v3593_v10 = vld [vmem:[%s5075_s1 + $0x2b0] ss:$48 sps:$4 sm:$0xff]   ;;  %v3596_v11 = vld [vmem:[%s5075_s1 + $0x2b8] ss:$48 sps:$4 sm:$0xff]  }
  0x48   :  { %1949 = vmatprep.subr.bf16.mxu0 %v3509_v13  ;;  %2031 = vmatprep.subr.bf16.mxu1 %v3512_v14  ;;  %v3601_v13 = vld [vmem:[%s5075_s1 + $0x314] ss:$48 sps:$4 sm:$0xff]   ;;  %v3604_v14 = vld [vmem:[%s5075_s1 + $0x31c] ss:$48 sps:$4 sm:$0xff]  }
  0x4b   :  { %1950 = vmatpush1.bf16.msra.mxu0 %v3507_v15  ;;  %2032 = vmatpush1.bf16.msra.mxu1 %v3510_v16  ;;  %v3599_v15 = vld [vmem:[%s5075_s1 + $0x310] ss:$48 sps:$4 sm:$0xff]   ;;  %v3602_v16 = vld [vmem:[%s5075_s1 + $0x318] ss:$48 sps:$4 sm:$0xff]  }
  0x4c   :  { %1951 = vmatprep.subr.bf16.mxu0 %v3515_v17  ;;  %2033 = vmatprep.subr.bf16.mxu1 %v3518_v18  ;;  %v3607_v17 = vld [vmem:[%s5075_s1 + $0x374] ss:$48 sps:$4 sm:$0xff]   ;;  %v3610_v18 = vld [vmem:[%s5075_s1 + $0x37c] ss:$48 sps:$4 sm:$0xff]  }
  0x4f   :  { %1952 = vmatpush1.bf16.msra.mxu0 %v3513_v19  ;;  %2034 = vmatpush1.bf16.msra.mxu1 %v3516_v20  ;;  %v3605_v19 = vld [vmem:[%s5075_s1 + $0x370] ss:$48 sps:$4 sm:$0xff]   ;;  %v3608_v20 = vld [vmem:[%s5075_s1 + $0x378] ss:$48 sps:$4 sm:$0xff]  }
  0x50   :  { %1953 = vmatprep.subr.bf16.mxu0 %v3521_v21  ;;  %2035 = vmatprep.subr.bf16.mxu1 %v3524_v22  ;;  %v3613_v21 = vld [vmem:[%s5075_s1 + $0x3d4] ss:$48 sps:$4 sm:$0xff]   ;;  %v3616_v22 = vld [vmem:[%s5075_s1 + $0x3dc] ss:$48 sps:$4 sm:$0xff]  }
  0x53   :  { %1954 = vmatpush1.bf16.msra.mxu0 %v3519_v23  ;;  %2036 = vmatpush1.bf16.msra.mxu1 %v3522_v24  ;;  %v3611_v23 = vld [vmem:[%s5075_s1 + $0x3d0] ss:$48 sps:$4 sm:$0xff]   ;;  %v3614_v24 = vld [vmem:[%s5075_s1 + $0x3d8] ss:$48 sps:$4 sm:$0xff]  }
  0x54   :  { %1955 = vmatprep.subr.bf16.mxu0 %v3527_v25  ;;  %2037 = vmatprep.subr.bf16.mxu1 %v3530_v26  ;;  %v3619_v25 = vld [vmem:[%s5075_s1 + $0x434] ss:$48 sps:$4 sm:$0xff]   ;;  %v3622_v26 = vld [vmem:[%s5075_s1 + $0x43c] ss:$48 sps:$4 sm:$0xff]  }
  0x57   :  { %1956 = vmatpush1.bf16.msra.mxu0 %v3525_v27  ;;  %2038 = vmatpush1.bf16.msra.mxu1 %v3528_v28  ;;  %v3617_v27 = vld [vmem:[%s5075_s1 + $0x430] ss:$48 sps:$4 sm:$0xff]   ;;  %v3620_v28 = vld [vmem:[%s5075_s1 + $0x438] ss:$48 sps:$4 sm:$0xff]  }
  0x58   :  { %1957 = vmatprep.subr.bf16.mxu0 %v3533_v29  ;;  %2039 = vmatprep.subr.bf16.mxu1 %v3536_v30  ;;  %v3625_v29 = vld [vmem:[%s5075_s1 + $0x494] ss:$48 sps:$4 sm:$0xff]   ;;  %v3628_v30 = vld [vmem:[%s5075_s1 + $0x49c] ss:$48 sps:$4 sm:$0xff]  }
  0x5b   :  { %1958 = vmatpush1.bf16.msra.mxu0 %v3531_v31  ;;  %2040 = vmatpush1.bf16.msra.mxu1 %v3534_v32  ;;  %v3623_v31 = vld [vmem:[%s5075_s1 + $0x490] ss:$48 sps:$4 sm:$0xff]   ;;  %v3626_v32 = vld [vmem:[%s5075_s1 + $0x498] ss:$48 sps:$4 sm:$0xff]  }
  0x5c   :  { %1959 = vmatprep.subr.bf16.mxu0 %v3539_v33  ;;  %2041 = vmatprep.subr.bf16.mxu1 %v3542_v34  ;;  %v3631_v33 = vld [vmem:[%s5075_s1 + $0x4f4] ss:$48 sps:$4 sm:$0xff]   ;;  %v3634_v34 = vld [vmem:[%s5075_s1 + $0x4fc] ss:$48 sps:$4 sm:$0xff]  }
  0x5f   :  { %1960 = vmatpush1.bf16.msra.mxu0 %v3537_v35  ;;  %2042 = vmatpush1.bf16.msra.mxu1 %v3540_v36  ;;  %v3629_v35 = vld [vmem:[%s5075_s1 + $0x4f0] ss:$48 sps:$4 sm:$0xff]   ;;  %v3632_v36 = vld [vmem:[%s5075_s1 + $0x4f8] ss:$48 sps:$4 sm:$0xff]  }
  0x60   :  { %1961 = vmatprep.subr.bf16.mxu0 %v3545_v37  ;;  %2043 = vmatprep.subr.bf16.mxu1 %v3548_v38  ;;  %v3637_v37 = vld [vmem:[%s5075_s1 + $0x554] ss:$48 sps:$4 sm:$0xff]   ;;  %v3640_v38 = vld [vmem:[%s5075_s1 + $0x55c] ss:$48 sps:$4 sm:$0xff]  }
  0x63   :  { %1962 = vmatpush1.bf16.msra.mxu0 %v3543_v39  ;;  %2044 = vmatpush1.bf16.msra.mxu1 %v3546_v40  ;;  %v3635_v39 = vld [vmem:[%s5075_s1 + $0x550] ss:$48 sps:$4 sm:$0xff]   ;;  %v3638_v40 = vld [vmem:[%s5075_s1 + $0x558] ss:$48 sps:$4 sm:$0xff]  }
  0x64   :  { %2068 = vmatprep.subr.bf16.mxu0 %v3553_v41  ;;  %2150 = vmatprep.subr.bf16.mxu1 %v3556_v42  ;;  %v3643_v41 = vld [vmem:[%s5075_s1 + $0x5b4] ss:$48 sps:$4 sm:$0xff]   ;;  %v3646_v42 = vld [vmem:[%s5075_s1 + $0x5bc] ss:$48 sps:$4 sm:$0xff]  }
  0x66   :  { %1978 = vmatmul.mubr.bf16.vlgmr.msra.gmra.mrb[0].mxu0 %v4261_v43  ;;  %2060 = vmatmul.mubr.bf16.vlgmr.msra.gmra.mrb[0].mxu1 %v4261_v43 }
  0x67   :  { %2069 = vmatpush1.bf16.msra.mxu0 %v3551_v44  ;;  %2151 = vmatpush1.bf16.msra.mxu1 %v3554_v45  ;;  %v3641_v44 = vld [vmem:[%s5075_s1 + $0x5b0] ss:$48 sps:$4 sm:$0xff]   ;;  %v3644_v45 = vld [vmem:[%s5075_s1 + $0x5b8] ss:$48 sps:$4 sm:$0xff]  }
  0x68   :  { %2070 = vmatprep.subr.bf16.mxu0 %v3559_v46  ;;  %2152 = vmatprep.subr.bf16.mxu1 %v3562_v47  ;;  %v3649_v46 = vld [vmem:[%s5075_s1 + $0x614] ss:$48 sps:$4 sm:$0xff]   ;;  %v3652_v47 = vld [vmem:[%s5075_s1 + $0x61c] ss:$48 sps:$4 sm:$0xff]  }
  0x69   :  { %2100 = vmatprep.mubr.bf16.mxu0 %v4073_v48  ;;  %2182 = vmatprep.mubr.bf16.mxu1 %v4073_v48 }
  0x6b   :  { %2071 = vmatpush1.bf16.msra.mxu0 %v3557_v49  ;;  %2153 = vmatpush1.bf16.msra.mxu1 %v3560_v50  ;;  %v3647_v49 = vld [vmem:[%s5075_s1 + $0x610] ss:$48 sps:$4 sm:$0xff]   ;;  %v3650_v50 = vld [vmem:[%s5075_s1 + $0x618] ss:$48 sps:$4 sm:$0xff]  }
  0x6c   :  { %2072 = vmatprep.subr.bf16.mxu0 %v3565_v51  ;;  %2154 = vmatprep.subr.bf16.mxu1 %v3568_v52  ;;  %v3655_v51 = vld [vmem:[%s5075_s1 + $0x674] ss:$48 sps:$4 sm:$0xff]   ;;  %v3658_v52 = vld [vmem:[%s5075_s1 + $0x67c] ss:$48 sps:$4 sm:$0xff]  }
  0x6f   :  { %2073 = vmatpush1.bf16.msra.mxu0 %v3563_v53  ;;  %2155 = vmatpush1.bf16.msra.mxu1 %v3566_v54  ;;  %v3653_v53 = vld [vmem:[%s5075_s1 + $0x670] ss:$48 sps:$4 sm:$0xff]   ;;  %v3656_v54 = vld [vmem:[%s5075_s1 + $0x678] ss:$48 sps:$4 sm:$0xff]  }
  0x70   :  { %2074 = vmatprep.subr.bf16.mxu0 %v3571_v55  ;;  %2156 = vmatprep.subr.bf16.mxu1 %v3574_v56  ;;  %v3661_v55 = vld [vmem:[%s5075_s1 + $0x6d4] ss:$48 sps:$4 sm:$0xff]   ;;  %v3664_v56 = vld [vmem:[%s5075_s1 + $0x6dc] ss:$48 sps:$4 sm:$0xff]  }
  0x73   :  { %2075 = vmatpush1.bf16.msra.mxu0 %v3569_v57  ;;  %2157 = vmatpush1.bf16.msra.mxu1 %v3572_v58  ;;  %v3659_v57 = vld [vmem:[%s5075_s1 + $0x6d0] ss:$48 sps:$4 sm:$0xff]   ;;  %v3662_v58 = vld [vmem:[%s5075_s1 + $0x6d8] ss:$48 sps:$4 sm:$0xff]  }
  0x74   :  { %2076 = vmatprep.subr.bf16.mxu0 %v3577_v59  ;;  %2158 = vmatprep.subr.bf16.mxu1 %v3580_v60  ;;  %v3667_v59 = vld [vmem:[%s5075_s1 + $0x734] ss:$48 sps:$4 sm:$0xff]   ;;  %v3670_v60 = vld [vmem:[%s5075_s1 + $0x73c] ss:$48 sps:$4 sm:$0xff]  }
  0x77   :  { %2077 = vmatpush1.bf16.msra.mxu0 %v3575_v61  ;;  %2159 = vmatpush1.bf16.msra.mxu1 %v3578_v62  ;;  %v3665_v61 = vld [vmem:[%s5075_s1 + $0x730] ss:$48 sps:$4 sm:$0xff]   ;;  %v3668_v62 = vld [vmem:[%s5075_s1 + $0x738] ss:$48 sps:$4 sm:$0xff]  }
  0x78   :  { %2078 = vmatprep.subr.bf16.mxu0 %v3583_v63  ;;  %2160 = vmatprep.subr.bf16.mxu1 %v3586_v0  ;;  %v3673_v63 = vld [vmem:[%s5075_s1 + $0x794] ss:$48 sps:$4 sm:$0xff]   ;;  %v3676_v0 = vld [vmem:[%s5075_s1 + $0x79c] ss:$48 sps:$4 sm:$0xff]  }
  0x7b   :  { %2079 = vmatpush1.bf16.msra.mxu0 %v3581_v1  ;;  %2161 = vmatpush1.bf16.msra.mxu1 %v3584_v2  ;;  %v3671_v1 = vld [vmem:[%s5075_s1 + $0x790] ss:$48 sps:$4 sm:$0xff]   ;;  %v3674_v2 = vld [vmem:[%s5075_s1 + $0x798] ss:$48 sps:$4 sm:$0xff]  }
  0x7c   :  { %2080 = vmatprep.subr.bf16.mxu0 %v3589_v3  ;;  %2162 = vmatprep.subr.bf16.mxu1 %v3592_v4  ;;  %v3679_v3 = vld [vmem:[%s5075_s1 + $0x7f4] ss:$48 sps:$4 sm:$0xff]   ;;  %v3682_v4 = vld [vmem:[%s5075_s1 + $0x7fc] ss:$48 sps:$4 sm:$0xff]  }
  0x7f   :  { %2081 = vmatpush1.bf16.msra.mxu0 %v3587_v6  ;;  %2163 = vmatpush1.bf16.msra.mxu1 %v3590_v7  ;;  %v3677_v6 = vld [vmem:[%s5075_s1 + $0x7f0] ss:$48 sps:$4 sm:$0xff]   ;;  %v3680_v7 = vld [vmem:[%s5075_s1 + $0x7f8] ss:$48 sps:$4 sm:$0xff]  }
  0x80   :  { %2082 = vmatprep.subr.bf16.mxu0 %v3595_v8  ;;  %2164 = vmatprep.subr.bf16.mxu1 %v3598_v9  ;;  %v3685_v8 = vld [vmem:[%s5075_s1 + $0x854] ss:$48 sps:$4 sm:$0xff]   ;;  %v3688_v9 = vld [vmem:[%s5075_s1 + $0x85c] ss:$48 sps:$4 sm:$0xff]  }
  0x83   :  { %2083 = vmatpush1.bf16.msra.mxu0 %v3593_v10  ;;  %2165 = vmatpush1.bf16.msra.mxu1 %v3596_v11  ;;  %v3683_v10 = vld [vmem:[%s5075_s1 + $0x850] ss:$48 sps:$4 sm:$0xff]   ;;  %v3686_v11 = vld [vmem:[%s5075_s1 + $0x858] ss:$48 sps:$4 sm:$0xff]  }
  0x84   :  { %2084 = vmatprep.subr.bf16.mxu0 %v3601_v13  ;;  %2166 = vmatprep.subr.bf16.mxu1 %v3604_v14  ;;  %v3691_v13 = vld [vmem:[%s5075_s1 + $0x8b4] ss:$48 sps:$4 sm:$0xff]   ;;  %v3694_v14 = vld [vmem:[%s5075_s1 + $0x8bc] ss:$48 sps:$4 sm:$0xff]  }
  0x87   :  { %2085 = vmatpush1.bf16.msra.mxu0 %v3599_v15  ;;  %2167 = vmatpush1.bf16.msra.mxu1 %v3602_v16  ;;  %v3689_v15 = vld [vmem:[%s5075_s1 + $0x8b0] ss:$48 sps:$4 sm:$0xff]   ;;  %v3692_v16 = vld [vmem:[%s5075_s1 + $0x8b8] ss:$48 sps:$4 sm:$0xff]  }
  0x88   :  { %2086 = vmatprep.subr.bf16.mxu0 %v3607_v17  ;;  %2168 = vmatprep.subr.bf16.mxu1 %v3610_v18  ;;  %v3697_v17 = vld [vmem:[%s5075_s1 + $0x914] ss:$48 sps:$4 sm:$0xff]   ;;  %v3700_v18 = vld [vmem:[%s5075_s1 + $0x91c] ss:$48 sps:$4 sm:$0xff]  }
  0x8b   :  { %2087 = vmatpush1.bf16.msra.mxu0 %v3605_v19  ;;  %2169 = vmatpush1.bf16.msra.mxu1 %v3608_v20  ;;  %v3695_v19 = vld [vmem:[%s5075_s1 + $0x910] ss:$48 sps:$4 sm:$0xff]   ;;  %v3698_v20 = vld [vmem:[%s5075_s1 + $0x918] ss:$48 sps:$4 sm:$0xff]  }
  0x8c   :  { %2088 = vmatprep.subr.bf16.mxu0 %v3613_v21  ;;  %2170 = vmatprep.subr.bf16.mxu1 %v3616_v22  ;;  %v3703_v21 = vld [vmem:[%s5075_s1 + $0x24] ss:$48 sps:$4 sm:$0xff]   ;;  %v3706_v22 = vld [vmem:[%s5075_s1 + $0x2c] ss:$48 sps:$4 sm:$0xff]  }
  0x8f   :  { %2089 = vmatpush1.bf16.msra.mxu0 %v3611_v23  ;;  %2171 = vmatpush1.bf16.msra.mxu1 %v3614_v24  ;;  %v3701_v23 = vld [vmem:[%s5075_s1 + $0x20] ss:$48 sps:$4 sm:$0xff]   ;;  %v3704_v24 = vld [vmem:[%s5075_s1 + $0x28] ss:$48 sps:$4 sm:$0xff]  }
  0x90   :  { %2090 = vmatprep.subr.bf16.mxu0 %v3619_v25  ;;  %2172 = vmatprep.subr.bf16.mxu1 %v3622_v26  ;;  %v3709_v25 = vld [vmem:[%s5075_s1 + $0x84] ss:$48 sps:$4 sm:$0xff]   ;;  %v3712_v26 = vld [vmem:[%s5075_s1 + $0x8c] ss:$48 sps:$4 sm:$0xff]  }
  0x93   :  { %2091 = vmatpush1.bf16.msra.mxu0 %v3617_v27  ;;  %2173 = vmatpush1.bf16.msra.mxu1 %v3620_v28  ;;  %v3707_v27 = vld [vmem:[%s5075_s1 + $0x80] ss:$48 sps:$4 sm:$0xff]   ;;  %v3710_v28 = vld [vmem:[%s5075_s1 + $0x88] ss:$48 sps:$4 sm:$0xff]  }
  0x94   :  { %2092 = vmatprep.subr.bf16.mxu0 %v3625_v29  ;;  %2174 = vmatprep.subr.bf16.mxu1 %v3628_v30  ;;  %v3715_v29 = vld [vmem:[%s5075_s1 + $0xe4] ss:$48 sps:$4 sm:$0xff]   ;;  %v3718_v30 = vld [vmem:[%s5075_s1 + $0xec] ss:$48 sps:$4 sm:$0xff]  }
  0x97   :  { %2093 = vmatpush1.bf16.msra.mxu0 %v3623_v31  ;;  %2175 = vmatpush1.bf16.msra.mxu1 %v3626_v32  ;;  %v3713_v31 = vld [vmem:[%s5075_s1 + $0xe0] ss:$48 sps:$4 sm:$0xff]   ;;  %v3716_v32 = vld [vmem:[%s5075_s1 + $0xe8] ss:$48 sps:$4 sm:$0xff]  }
  0x98   :  { %2094 = vmatprep.subr.bf16.mxu0 %v3631_v33  ;;  %2176 = vmatprep.subr.bf16.mxu1 %v3634_v34  ;;  %v3721_v33 = vld [vmem:[%s5075_s1 + $0x144] ss:$48 sps:$4 sm:$0xff]   ;;  %v3724_v34 = vld [vmem:[%s5075_s1 + $0x14c] ss:$48 sps:$4 sm:$0xff]  }
  0x9b   :  { %2095 = vmatpush1.bf16.msra.mxu0 %v3629_v35  ;;  %2177 = vmatpush1.bf16.msra.mxu1 %v3632_v36  ;;  %v3722_v35 = vld [vmem:[%s5075_s1 + $0x148] ss:$48 sps:$4 sm:$0xff]   ;;  %v3727_v36 = vld [vmem:[%s5075_s1 + $0x1a4] ss:$48 sps:$4 sm:$0xff]  }
  0x9c   :  { %2096 = vmatprep.subr.bf16.mxu0 %v3637_v37  ;;  %2178 = vmatprep.subr.bf16.mxu1 %v3640_v38  ;;  %v3730_v37 = vld [vmem:[%s5075_s1 + $0x1ac] ss:$48 sps:$4 sm:$0xff]   ;;  %v3725_v38 = vld [vmem:[%s5075_s1 + $0x1a0] ss:$48 sps:$4 sm:$0xff]  }
  0x9f   :  { %2097 = vmatpush1.bf16.msra.mxu0 %v3635_v39  ;;  %2179 = vmatpush1.bf16.msra.mxu1 %v3638_v40  ;;  %v3728_v39 = vld [vmem:[%s5075_s1 + $0x1a8] ss:$48 sps:$4 sm:$0xff]   ;;  %v3733_v40 = vld [vmem:[%s5075_s1 + $0x204] ss:$48 sps:$4 sm:$0xff]  }
  0xa0   :  { %2098 = vmatprep.subr.bf16.mxu0 %v3643_v41  ;;  %2180 = vmatprep.subr.bf16.mxu1 %v3646_v42  ;;  %v3736_v41 = vld [vmem:[%s5075_s1 + $0x20c] ss:$48 sps:$4 sm:$0xff]   ;;  %v3731_v42 = vld [vmem:[%s5075_s1 + $0x200] ss:$48 sps:$4 sm:$0xff]  }
  0xa3   :  { %2099 = vmatpush1.bf16.msra.mxu0 %v3641_v44  ;;  %2181 = vmatpush1.bf16.msra.mxu1 %v3644_v45  ;;  %v3734_v44 = vld [vmem:[%s5075_s1 + $0x208] ss:$48 sps:$4 sm:$0xff]   ;;  %v3739_v45 = vld [vmem:[%s5075_s1 + $0x264] ss:$48 sps:$4 sm:$0xff]  }
  0xa4   :  { %2109 = vmatprep.subr.bf16.mxu0 %v3649_v46  ;;  %2191 = vmatprep.subr.bf16.mxu1 %v3652_v47  ;;  %v3742_v46 = vld [vmem:[%s5075_s1 + $0x26c] ss:$48 sps:$4 sm:$0xff]   ;;  %v3737_v47 = vld [vmem:[%s5075_s1 + $0x260] ss:$48 sps:$4 sm:$0xff]  }
  0xa6   :  { %2101 = vmatmul.mubr.bf16.vlgmr.msra.gmra.mrb[4].mxu0 %v4137_v5  ;;  %2183 = vmatmul.mubr.bf16.vlgmr.msra.gmra.mrb[4].mxu1 %v4137_v5 }
  0xa7   :  { %2110 = vmatpush1.bf16.msra.mxu0 %v3647_v49  ;;  %2192 = vmatpush1.bf16.msra.mxu1 %v3650_v50  ;;  %v3740_v49 = vld [vmem:[%s5075_s1 + $0x268] ss:$48 sps:$4 sm:$0xff]   ;;  %v3745_v50 = vld [vmem:[%s5075_s1 + $0x2c4] ss:$48 sps:$4 sm:$0xff]  }
  0xa8   :  { %2111 = vmatprep.subr.bf16.mxu0 %v3655_v51  ;;  %2193 = vmatprep.subr.bf16.mxu1 %v3658_v52  ;;  %v3748_v51 = vld [vmem:[%s5075_s1 + $0x2cc] ss:$48 sps:$4 sm:$0xff]   ;;  %v3743_v52 = vld [vmem:[%s5075_s1 + $0x2c0] ss:$48 sps:$4 sm:$0xff]  }
  0xa9   :  { %3242 = vmatprep.mubr.msk.bf16.mxu0 %vm1900_vm0, %v4163_v12  ;;  %3243 = vmatprep.mubr.msk.bf16.mxu1 %vm1900_vm0, %v4163_v12 }
  0xab   :  { %2112 = vmatpush1.bf16.msra.mxu0 %v3653_v53  ;;  %2194 = vmatpush1.bf16.msra.mxu1 %v3656_v54  ;;  %v3746_v53 = vld [vmem:[%s5075_s1 + $0x2c8] ss:$48 sps:$4 sm:$0xff]   ;;  %v3751_v54 = vld [vmem:[%s5075_s1 + $0x324] ss:$48 sps:$4 sm:$0xff]  }
  0xac   :  { %2113 = vmatprep.subr.bf16.mxu0 %v3661_v55  ;;  %2195 = vmatprep.subr.bf16.mxu1 %v3664_v56  ;;  %v3754_v55 = vld [vmem:[%s5075_s1 + $0x32c] ss:$48 sps:$4 sm:$0xff]   ;;  %v3749_v56 = vld [vmem:[%s5075_s1 + $0x320] ss:$48 sps:$4 sm:$0xff]  }
  0xaf   :  { %2114 = vmatpush1.bf16.msra.mxu0 %v3659_v57  ;;  %2196 = vmatpush1.bf16.msra.mxu1 %v3662_v58  ;;  %v3752_v57 = vld [vmem:[%s5075_s1 + $0x328] ss:$48 sps:$4 sm:$0xff]   ;;  %v3757_v58 = vld [vmem:[%s5075_s1 + $0x384] ss:$48 sps:$4 sm:$0xff]  }
  0xb0   :  { %2115 = vmatprep.subr.bf16.mxu0 %v3667_v59  ;;  %2197 = vmatprep.subr.bf16.mxu1 %v3670_v60  ;;  %v3760_v59 = vld [vmem:[%s5075_s1 + $0x38c] ss:$48 sps:$4 sm:$0xff]   ;;  %v3755_v60 = vld [vmem:[%s5075_s1 + $0x380] ss:$48 sps:$4 sm:$0xff]  }
  0xb3   :  { %2116 = vmatpush1.bf16.msra.mxu0 %v3665_v61  ;;  %2198 = vmatpush1.bf16.msra.mxu1 %v3668_v62  ;;  %v3758_v61 = vld [vmem:[%s5075_s1 + $0x388] ss:$48 sps:$4 sm:$0xff]   ;;  %v3763_v62 = vld [vmem:[%s5075_s1 + $0x3e4] ss:$48 sps:$4 sm:$0xff]  }
  0xb4   :  { %2117 = vmatprep.subr.bf16.mxu0 %v3673_v63  ;;  %2199 = vmatprep.subr.bf16.mxu1 %v3676_v0  ;;  %v3766_v63 = vld [vmem:[%s5075_s1 + $0x3ec] ss:$48 sps:$4 sm:$0xff]   ;;  %v3761_v0 = vld [vmem:[%s5075_s1 + $0x3e0] ss:$48 sps:$4 sm:$0xff]  }
  0xb7   :  { %2118 = vmatpush1.bf16.msra.mxu0 %v3671_v1  ;;  %2200 = vmatpush1.bf16.msra.mxu1 %v3674_v2  ;;  %v3764_v1 = vld [vmem:[%s5075_s1 + $0x3e8] ss:$48 sps:$4 sm:$0xff]   ;;  %v3769_v2 = vld [vmem:[%s5075_s1 + $0x444] ss:$48 sps:$4 sm:$0xff]  }
  0xb8   :  { %2119 = vmatprep.subr.bf16.mxu0 %v3679_v3  ;;  %2201 = vmatprep.subr.bf16.mxu1 %v3682_v4  ;;  %v3772_v3 = vld [vmem:[%s5075_s1 + $0x44c] ss:$48 sps:$4 sm:$0xff]   ;;  %v3767_v4 = vld [vmem:[%s5075_s1 + $0x440] ss:$48 sps:$4 sm:$0xff]  }
  0xbb   :  { %2120 = vmatpush1.bf16.msra.mxu0 %v3677_v6  ;;  %2202 = vmatpush1.bf16.msra.mxu1 %v3680_v7  ;;  %v3770_v6 = vld [vmem:[%s5075_s1 + $0x448] ss:$48 sps:$4 sm:$0xff]   ;;  %v3775_v7 = vld [vmem:[%s5075_s1 + $0x4a4] ss:$48 sps:$4 sm:$0xff]  }
  0xbc   :  { %2121 = vmatprep.subr.bf16.mxu0 %v3685_v8  ;;  %2203 = vmatprep.subr.bf16.mxu1 %v3688_v9  ;;  %v3778_v8 = vld [vmem:[%s5075_s1 + $0x4ac] ss:$48 sps:$4 sm:$0xff]   ;;  %v3773_v9 = vld [vmem:[%s5075_s1 + $0x4a0] ss:$48 sps:$4 sm:$0xff]  }
  0xbf   :  { %2122 = vmatpush1.bf16.msra.mxu0 %v3683_v10  ;;  %2204 = vmatpush1.bf16.msra.mxu1 %v3686_v11  ;;  %v3776_v10 = vld [vmem:[%s5075_s1 + $0x4a8] ss:$48 sps:$4 sm:$0xff]   ;;  %v3781_v11 = vld [vmem:[%s5075_s1 + $0x504] ss:$48 sps:$4 sm:$0xff]  }
  0xc0   :  { %2123 = vmatprep.subr.bf16.mxu0 %v3691_v13  ;;  %2205 = vmatprep.subr.bf16.mxu1 %v3694_v14  ;;  %v3784_v13 = vld [vmem:[%s5075_s1 + $0x50c] ss:$48 sps:$4 sm:$0xff]   ;;  %v3779_v14 = vld [vmem:[%s5075_s1 + $0x500] ss:$48 sps:$4 sm:$0xff]  }
  0xc3   :  { %2124 = vmatpush1.bf16.msra.mxu0 %v3689_v15  ;;  %2206 = vmatpush1.bf16.msra.mxu1 %v3692_v16  ;;  %v3782_v15 = vld [vmem:[%s5075_s1 + $0x508] ss:$48 sps:$4 sm:$0xff]   ;;  %v3787_v16 = vld [vmem:[%s5075_s1 + $0x564] ss:$48 sps:$4 sm:$0xff]  }
  0xc4   :  { %2125 = vmatprep.subr.bf16.mxu0 %v3697_v17  ;;  %2207 = vmatprep.subr.bf16.mxu1 %v3700_v18  ;;  %v3790_v17 = vld [vmem:[%s5075_s1 + $0x56c] ss:$48 sps:$4 sm:$0xff]   ;;  %v3785_v18 = vld [vmem:[%s5075_s1 + $0x560] ss:$48 sps:$4 sm:$0xff]  }
  0xc7   :  { %2126 = vmatpush1.bf16.msra.mxu0 %v3695_v19  ;;  %2208 = vmatpush1.bf16.msra.mxu1 %v3698_v20  ;;  %v3788_v19 = vld [vmem:[%s5075_s1 + $0x568] ss:$48 sps:$4 sm:$0xff]   ;;  %v3793_v20 = vld [vmem:[%s5075_s1 + $0x5c4] ss:$48 sps:$4 sm:$0xff]  }
  0xc8   :  { %2232 = vmatprep.subr.bf16.mxu0 %v3703_v21  ;;  %2314 = vmatprep.subr.bf16.mxu1 %v3706_v22  ;;  %v3796_v21 = vld [vmem:[%s5075_s1 + $0x5cc] ss:$48 sps:$4 sm:$0xff]   ;;  %v3791_v22 = vld [vmem:[%s5075_s1 + $0x5c0] ss:$48 sps:$4 sm:$0xff]  }
  0xca   :  { %2142 = vmatmul.mubr.bf16.vlgmr.msra.gmra.mrb[4].mxu0 %v4261_v43  ;;  %2224 = vmatmul.mubr.bf16.vlgmr.msra.gmra.mrb[4].mxu1 %v4261_v43 }
  0xcb   :  { %2233 = vmatpush1.bf16.msra.mxu0 %v3701_v23  ;;  %2315 = vmatpush1.bf16.msra.mxu1 %v3704_v24  ;;  %v3794_v23 = vld [vmem:[%s5075_s1 + $0x5c8] ss:$48 sps:$4 sm:$0xff]   ;;  %v3799_v24 = vld [vmem:[%s5075_s1 + $0x624] ss:$48 sps:$4 sm:$0xff]  }
  0xcc   :  { %2234 = vmatprep.subr.bf16.mxu0 %v3709_v25  ;;  %2316 = vmatprep.subr.bf16.mxu1 %v3712_v26  ;;  %v3802_v25 = vld [vmem:[%s5075_s1 + $0x62c] ss:$48 sps:$4 sm:$0xff]   ;;  %v3797_v26 = vld [vmem:[%s5075_s1 + $0x620] ss:$48 sps:$4 sm:$0xff]  }
  0xcd   :  { %2264 = vmatprep.mubr.bf16.mxu0 %v4073_v48  ;;  %2346 = vmatprep.mubr.bf16.mxu1 %v4073_v48  ;;  %v3719_v48 = vld [vmem:[%s5075_s1 + $0x140] ss:$48 sps:$4 sm:$0xff]  }
  0xcf   :  { %2235 = vmatpush1.bf16.msra.mxu0 %v3707_v27  ;;  %2317 = vmatpush1.bf16.msra.mxu1 %v3710_v28  ;;  %v3800_v27 = vld [vmem:[%s5075_s1 + $0x628] ss:$48 sps:$4 sm:$0xff]   ;;  %v3805_v28 = vld [vmem:[%s5075_s1 + $0x684] ss:$48 sps:$4 sm:$0xff]  }
  0xd0   :  { %2236 = vmatprep.subr.bf16.mxu0 %v3715_v29  ;;  %2318 = vmatprep.subr.bf16.mxu1 %v3718_v30  ;;  %v3808_v29 = vld [vmem:[%s5075_s1 + $0x68c] ss:$48 sps:$4 sm:$0xff]   ;;  %v3803_v30 = vld [vmem:[%s5075_s1 + $0x680] ss:$48 sps:$4 sm:$0xff]  }
  0xd3   :  { %2237 = vmatpush1.bf16.msra.mxu0 %v3713_v31  ;;  %2319 = vmatpush1.bf16.msra.mxu1 %v3716_v32  ;;  %v3806_v31 = vld [vmem:[%s5075_s1 + $0x688] ss:$48 sps:$4 sm:$0xff]   ;;  %v3811_v32 = vld [vmem:[%s5075_s1 + $0x6e4] ss:$48 sps:$4 sm:$0xff]  }
  0xd4   :  { %2238 = vmatprep.subr.bf16.mxu0 %v3721_v33  ;;  %2320 = vmatprep.subr.bf16.mxu1 %v3724_v34  ;;  %v3809_v33 = vld [vmem:[%s5075_s1 + $0x6e0] ss:$48 sps:$4 sm:$0xff]   ;;  %v3812_v34 = vld [vmem:[%s5075_s1 + $0x6e8] ss:$48 sps:$4 sm:$0xff]  }
  0xd7   :  { %2239 = vmatpush1.bf16.msra.mxu0 %v3719_v48  ;;  %2321 = vmatpush1.bf16.msra.mxu1 %v3722_v35  ;;  %v3817_v48 = vld [vmem:[%s5075_s1 + $0x744] ss:$48 sps:$4 sm:$0xff]   ;;  %v3815_v35 = vld [vmem:[%s5075_s1 + $0x740] ss:$48 sps:$4 sm:$0xff]  }
  0xd8   :  { %2240 = vmatprep.subr.bf16.mxu0 %v3727_v36  ;;  %2322 = vmatprep.subr.bf16.mxu1 %v3730_v37  ;;  %v3818_v36 = vld [vmem:[%s5075_s1 + $0x748] ss:$48 sps:$4 sm:$0xff]   ;;  %v3823_v37 = vld [vmem:[%s5075_s1 + $0x7a4] ss:$48 sps:$4 sm:$0xff]  }
  0xdb   :  { %2241 = vmatpush1.bf16.msra.mxu0 %v3725_v38  ;;  %2323 = vmatpush1.bf16.msra.mxu1 %v3728_v39  ;;  %v3826_v38 = vld [vmem:[%s5075_s1 + $0x7ac] ss:$48 sps:$4 sm:$0xff]   ;;  %v3821_v39 = vld [vmem:[%s5075_s1 + $0x7a0] ss:$48 sps:$4 sm:$0xff]  }
  0xdc   :  { %2242 = vmatprep.subr.bf16.mxu0 %v3733_v40  ;;  %2324 = vmatprep.subr.bf16.mxu1 %v3736_v41  ;;  %v3824_v40 = vld [vmem:[%s5075_s1 + $0x7a8] ss:$48 sps:$4 sm:$0xff]   ;;  %v3829_v41 = vld [vmem:[%s5075_s1 + $0x804] ss:$48 sps:$4 sm:$0xff]  }
  0xdf   :  { %2243 = vmatpush1.bf16.msra.mxu0 %v3731_v42  ;;  %2325 = vmatpush1.bf16.msra.mxu1 %v3734_v44  ;;  %v3832_v42 = vld [vmem:[%s5075_s1 + $0x80c] ss:$48 sps:$4 sm:$0xff]   ;;  %v3827_v44 = vld [vmem:[%s5075_s1 + $0x800] ss:$48 sps:$4 sm:$0xff]  }
  0xe0   :  { %2244 = vmatprep.subr.bf16.mxu0 %v3739_v45  ;;  %2326 = vmatprep.subr.bf16.mxu1 %v3742_v46  ;;  %v3830_v45 = vld [vmem:[%s5075_s1 + $0x808] ss:$48 sps:$4 sm:$0xff]   ;;  %v3835_v46 = vld [vmem:[%s5075_s1 + $0x864] ss:$48 sps:$4 sm:$0xff]  }
  0xe3   :  { %2245 = vmatpush1.bf16.msra.mxu0 %v3737_v47  ;;  %2327 = vmatpush1.bf16.msra.mxu1 %v3740_v49  ;;  %v3838_v47 = vld [vmem:[%s5075_s1 + $0x86c] ss:$48 sps:$4 sm:$0xff]   ;;  %v3833_v49 = vld [vmem:[%s5075_s1 + $0x860] ss:$48 sps:$4 sm:$0xff]  }
  0xe4   :  { %2246 = vmatprep.subr.bf16.mxu0 %v3745_v50  ;;  %2328 = vmatprep.subr.bf16.mxu1 %v3748_v51  ;;  %v3836_v50 = vld [vmem:[%s5075_s1 + $0x868] ss:$48 sps:$4 sm:$0xff]   ;;  %v3841_v51 = vld [vmem:[%s5075_s1 + $0x8c4] ss:$48 sps:$4 sm:$0xff]  }
  0xe7   :  { %2247 = vmatpush1.bf16.msra.mxu0 %v3743_v52  ;;  %2329 = vmatpush1.bf16.msra.mxu1 %v3746_v53  ;;  %v3844_v52 = vld [vmem:[%s5075_s1 + $0x8cc] ss:$48 sps:$4 sm:$0xff]   ;;  %v3839_v53 = vld [vmem:[%s5075_s1 + $0x8c0] ss:$48 sps:$4 sm:$0xff]  }
  0xe8   :  { %2248 = vmatprep.subr.bf16.mxu0 %v3751_v54  ;;  %2330 = vmatprep.subr.bf16.mxu1 %v3754_v55  ;;  %v3842_v54 = vld [vmem:[%s5075_s1 + $0x8c8] ss:$48 sps:$4 sm:$0xff]   ;;  %v3847_v55 = vld [vmem:[%s5075_s1 + $0x924] ss:$48 sps:$4 sm:$0xff]  }
  0xeb   :  { %2249 = vmatpush1.bf16.msra.mxu0 %v3749_v56  ;;  %2331 = vmatpush1.bf16.msra.mxu1 %v3752_v57  ;;  %v3850_v56 = vld [vmem:[%s5075_s1 + $0x92c] ss:$48 sps:$4 sm:$0xff]   ;;  %v3845_v57 = vld [vmem:[%s5075_s1 + $0x920] ss:$48 sps:$4 sm:$0xff]  }
  0xec   :  { %2250 = vmatprep.subr.bf16.mxu0 %v3757_v58  ;;  %2332 = vmatprep.subr.bf16.mxu1 %v3760_v59  ;;  %v3848_v58 = vld [vmem:[%s5075_s1 + $0x928] ss:$48 sps:$4 sm:$0xff]   ;;  %v3851_v59 = vld [vmem:[%s5077_s3 + $0x40] sm:$0xff]  }
  0xef   :  { %2251 = vmatpush1.bf16.msra.mxu0 %v3755_v60  ;;  %2333 = vmatpush1.bf16.msra.mxu1 %v3758_v61  ;;  %v3867_v60 = vld [vmem:[%s5077_s3 + $0xc0] sm:$0xff]  }
  0xf0   :  { %2252 = vmatprep.subr.bf16.mxu0 %v3763_v62  ;;  %2334 = vmatprep.subr.bf16.mxu1 %v3766_v63  ;;  %v3852_v61 = vld [vmem:[%s5077_s3] sm:$0xff]   ;;  %v3853_v63 = vld [vmem:[%s5077_s3 + $0x48] sm:$0xff]  }
  0xf1   :  { %v3869_v62 = vld [vmem:[%s5077_s3 + $0x80] sm:$0xff]  }
  0xf3   :  { %2253 = vmatpush1.bf16.msra.mxu0 %v3761_v0  ;;  %2335 = vmatpush1.bf16.msra.mxu1 %v3764_v1  ;;  %v3871_v0 = vld [vmem:[%s5077_s3 + $0xc8] sm:$0xff]  }
  0xf4   :  { %2254 = vmatprep.subr.bf16.mxu0 %v3769_v2  ;;  %2336 = vmatprep.subr.bf16.mxu1 %v3772_v3  ;;  %v3854_v1 = vld [vmem:[%s5077_s3 + $0x8] sm:$0xff]   ;;  %v3855_v3 = vld [vmem:[%s5077_s3 + $0x50] sm:$0xff]  }
  0xf5   :  { %v3873_v2 = vld [vmem:[%s5077_s3 + $0x88] sm:$0xff]  }
  0xf7   :  { %2255 = vmatpush1.bf16.msra.mxu0 %v3767_v4  ;;  %2337 = vmatpush1.bf16.msra.mxu1 %v3770_v6  ;;  %v3856_v4 = vld [vmem:[%s5077_s3 + $0x10] sm:$0xff]  }
  0xf8   :  { %2256 = vmatprep.subr.bf16.mxu0 %v3775_v7  ;;  %2338 = vmatprep.subr.bf16.mxu1 %v3778_v8  ;;  %v3877_v6 = vld [vmem:[%s5077_s3 + $0x90] sm:$0xff]   ;;  %v3857_v7 = vld [vmem:[%s5077_s3 + $0x58] sm:$0xff]  }
  0xf9   :  { %v3879_v8 = vld [vmem:[%s5077_s3 + $0xd8] sm:$0xff]  }
  0xfb   :  { %2257 = vmatpush1.bf16.msra.mxu0 %v3773_v9  ;;  %2339 = vmatpush1.bf16.msra.mxu1 %v3776_v10  ;;  %v3858_v9 = vld [vmem:[%s5077_s3 + $0x18] sm:$0xff]  }
  0xfc   :  { %2258 = vmatprep.subr.bf16.mxu0 %v3781_v11  ;;  %2340 = vmatprep.subr.bf16.mxu1 %v3784_v13  ;;  %v3881_v10 = vld [vmem:[%s5077_s3 + $0x98] sm:$0xff]   ;;  %v3859_v11 = vld [vmem:[%s5077_s3 + $0x60] sm:$0xff]  }
  0xfd   :  { %v3883_v13 = vld [vmem:[%s5077_s3 + $0xe0] sm:$0xff]  }
  0xff   :  { %2259 = vmatpush1.bf16.msra.mxu0 %v3779_v14  ;;  %2341 = vmatpush1.bf16.msra.mxu1 %v3782_v15 }
 0x100   :  { %2260 = vmatprep.subr.bf16.mxu0 %v3787_v16  ;;  %2342 = vmatprep.subr.bf16.mxu1 %v3790_v17 }
 0x103   :  { %2261 = vmatpush1.bf16.msra.mxu0 %v3785_v18  ;;  %2343 = vmatpush1.bf16.msra.mxu1 %v3788_v19 }
 0x104   :  { %2262 = vmatprep.subr.bf16.mxu0 %v3793_v20  ;;  %2344 = vmatprep.subr.bf16.mxu1 %v3796_v21  ;;  %v3860_v20 = vld [vmem:[%s5077_s3 + $0x20] sm:$0xff]  }
 0x105   :  { %v3885_v21 = vld [vmem:[%s5077_s3 + $0xa0] sm:$0xff]  }
 0x107   :  { %2263 = vmatpush1.bf16.msra.mxu0 %v3791_v22  ;;  %2345 = vmatpush1.bf16.msra.mxu1 %v3794_v23 }
 0x108   :  { %2273 = vmatprep.subr.bf16.mxu0 %v3799_v24  ;;  %2355 = vmatprep.subr.bf16.mxu1 %v3802_v25  ;;  %v3861_v24 = vld [vmem:[%s5077_s3 + $0x68] sm:$0xff]  }
 0x109   :  { %v3887_v25 = vld [vmem:[%s5077_s3 + $0xe8] sm:$0xff]  }
 0x10a   :  { %2265 = vmatmul.mubr.bf16.vlgmr.msra.gmra.mrb[8].mxu0 %v4137_v5  ;;  %2347 = vmatmul.mubr.bf16.vlgmr.msra.gmra.mrb[8].mxu1 %v4137_v5  ;;  %v3814_v5 = vld [vmem:[%s5075_s1 + $0x6ec] ss:$48 sps:$4 sm:$0xff]  }
 0x10b   :  { %2274 = vmatpush1.bf16.msra.mxu0 %v3797_v26  ;;  %2356 = vmatpush1.bf16.msra.mxu1 %v3800_v27  ;;  %v3862_v26 = vld [vmem:[%s5077_s3 + $0x28] sm:$0xff]   ;;  %v3863_v27 = vld [vmem:[%s5077_s3 + $0x70] sm:$0xff]  }
 0x10c   :  { %2275 = vmatprep.subr.bf16.mxu0 %v3805_v28  ;;  %2357 = vmatprep.subr.bf16.mxu1 %v3808_v29  ;;  %v3864_v28 = vld [vmem:[%s5077_s3 + $0x30] sm:$0xff]   ;;  %v3865_v29 = vld [vmem:[%s5077_s3 + $0x78] sm:$0xff]  }
 0x10d   :  { %3244 = vmatprep.mubr.msk.bf16.mxu0 %vm1900_vm0, %v4163_v12  ;;  %3245 = vmatprep.mubr.msk.bf16.mxu1 %vm1900_vm0, %v4163_v12  ;;  %v3820_v12 = vld [vmem:[%s5075_s1 + $0x74c] ss:$48 sps:$4 sm:$0xff]  }
 0x10f   :  { %2276 = vmatpush1.bf16.msra.mxu0 %v3803_v30  ;;  %2358 = vmatpush1.bf16.msra.mxu1 %v3806_v31  ;;  %v3866_v30 = vld [vmem:[%s5077_s3 + $0x38] sm:$0xff]   ;;  %v3868_v31 = vld [vmem:[%s5077_s3 + $0x140] sm:$0xff]  }
 0x110   :  { %2277 = vmatprep.subr.bf16.mxu0 %v3811_v32  ;;  %2359 = vmatprep.subr.bf16.mxu1 %v3814_v5  ;;  %v3889_v32 = vld [vmem:[%s5077_s3 + $0xa8] sm:$0xff]   ;;  %v3891_v5 = vld [vmem:[%s5077_s3 + $0xf0] sm:$0xff]  }
 0x113   :  { %2278 = vmatpush1.bf16.msra.mxu0 %v3809_v33  ;;  %2360 = vmatpush1.bf16.msra.mxu1 %v3812_v34  ;;  %v3893_v33 = vld [vmem:[%s5077_s3 + $0xb0] sm:$0xff]   ;;  %v3895_v34 = vld [vmem:[%s5077_s3 + $0xf8] sm:$0xff]  }
 0x114   :  { %2279 = vmatprep.subr.bf16.mxu0 %v3817_v48  ;;  %2361 = vmatprep.subr.bf16.mxu1 %v3820_v12  ;;  %v3897_v48 = vld [vmem:[%s5077_s3 + $0xb8] sm:$0xff]   ;;  %v327_v12 = vlaneseq }
 0x117   :  { %2280 = vmatpush1.bf16.msra.mxu0 %v3815_v35  ;;  %2362 = vmatpush1.bf16.msra.mxu1 %v3818_v36  ;;  %v4982_v35 = vshrl.u32 %v327_v12, 7 }
 0x118   :  { %2281 = vmatprep.subr.bf16.mxu0 %v3823_v37  ;;  %2363 = vmatprep.subr.bf16.mxu1 %v3826_v38  ;;  %v4988_v37 = vld [vmem:[%s5078_s2] sm:$0xff] }
 0x119   :  { %v329_v36 = vsub.s32 0, %v4982_v35  ;;  %v333_v38 = vsub.s32 1, %v4982_v35 }
 0x11b   :  { %2282 = vmatpush1.bf16.msra.mxu0 %v3821_v39  ;;  %2364 = vmatpush1.bf16.msra.mxu1 %v3824_v40  ;;  %v353_v39 = vsub.s32 6, %v4982_v35  ;;  %v357_v40 = vsub.s32 7, %v4982_v35 }
 0x11c   :  { %2283 = vmatprep.subr.bf16.mxu0 %v3829_v41  ;;  %2365 = vmatprep.subr.bf16.mxu1 %v3832_v42  ;;  %v330_v41 = vrot.slane %v4988_v37, %v329_v36  ;;  %v334_v42 = vrot.slane %v4988_v37, %v333_v38 }
 0x11f   :  { %2284 = vmatpush1.bf16.msra.mxu0 %v3827_v44  ;;  %2366 = vmatpush1.bf16.msra.mxu1 %v3830_v45  ;;  %v354_v44 = vrot.slane %v4988_v37, %v353_v39  ;;  %v358_v45 = vrot.slane %v4988_v37, %v357_v40 }
 0x120   :  { %2285 = vmatprep.subr.bf16.mxu0 %v3835_v46  ;;  %2367 = vmatprep.subr.bf16.mxu1 %v3838_v47 }
 0x123   :  { %2286 = vmatpush1.bf16.msra.mxu0 %v3833_v49  ;;  %2368 = vmatpush1.bf16.msra.mxu1 %v3836_v50 }
 0x124   :  { %2287 = vmatprep.subr.bf16.mxu0 %v3841_v51  ;;  %2369 = vmatprep.subr.bf16.mxu1 %v3844_v52 }
 0x127   :  { %2288 = vmatpush1.bf16.msra.mxu0 %v3839_v53  ;;  %2370 = vmatpush1.bf16.msra.mxu1 %v3842_v54 }
 0x128   :  { %2289 = vmatprep.subr.bf16.mxu0 %v3847_v55  ;;  %2371 = vmatprep.subr.bf16.mxu1 %v3850_v56 }
 0x12b   :  { %2290 = vmatpush1.bf16.msra.mxu0 %v3845_v57  ;;  %2372 = vmatpush1.bf16.msra.mxu1 %v3848_v58 }
 0x12c   :  { %3295 = vmatprep.subr.bf16.mxu0 %v3851_v59  ;;  %3317 = vmatprep.subr.bf16.mxu1 %v3867_v60 }
 0x12e   :  { %2306 = vmatmul.mubr.bf16.vlgmr.msra.gmra.mrb[8].mxu0 %v4261_v43  ;;  %2388 = vmatmul.mubr.bf16.vlgmr.msra.gmra.mrb[8].mxu1 %v4261_v43  ;;  %v3875_v43 = vld [vmem:[%s5077_s3 + $0xd0] sm:$0xff]  }
 0x12f   :  { %3296 = vmatpush3.bf16.msra.mxu0 %v3852_v61  ;;  %3318 = vmatpush3.bf16.msra.mxu1 %v3869_v62 }
 0x130   :  { %3297 = vmatprep.subr.bf16.mxu0 %v3853_v63  ;;  %3319 = vmatprep.subr.bf16.mxu1 %v3871_v0 }
 0x133   :  { %3298 = vmatpush3.bf16.msra.mxu0 %v3854_v1  ;;  %3320 = vmatpush3.bf16.msra.mxu1 %v3873_v2  ;;  %v3870_v2 = vld [vmem:[%s5077_s3 + $0x100] sm:$0xff]  }
 0x134   :  { %3299 = vmatprep.subr.bf16.mxu0 %v3855_v3  ;;  %3321 = vmatprep.subr.bf16.mxu1 %v3875_v43  ;;  %v3872_v43 = vld [vmem:[%s5077_s3 + $0x148] sm:$0xff]  }
 0x137   :  { %3300 = vmatpush3.bf16.msra.mxu0 %v3856_v4  ;;  %3322 = vmatpush3.bf16.msra.mxu1 %v3877_v6  ;;  %v3874_v4 = vld [vmem:[%s5077_s3 + $0x108] sm:$0xff]   ;;  %v3876_v6 = vld [vmem:[%s5077_s3 + $0x150] sm:$0xff]  }
 0x138   :  { %3301 = vmatprep.subr.bf16.mxu0 %v3857_v7  ;;  %3323 = vmatprep.subr.bf16.mxu1 %v3879_v8  ;;  %v3878_v7 = vld [vmem:[%s5077_s3 + $0x110] sm:$0xff]   ;;  %v3880_v8 = vld [vmem:[%s5077_s3 + $0x158] sm:$0xff]  }
 0x139   :  { %v1979_v14 = vpop.f32.mrb[0].mxu0  ;;  %v4933_v15 = vpop.f32.mrb[0].mxu1 }
 0x13a   :  { %v1981_v16 = vpop.f32.mrb[1].mxu0  ;;  %v4935_v17 = vpop.f32.mrb[1].mxu1  ;;  %v3361_v46 = vadd.f32 %v1979_v14, %v330_v41  ;;  %v3890_v14 = vld [vmem:[%s5077_s3 + $0x128] sm:$0xff]  }
 0x13b   :  { %v1983_v18 = vpop.f32.mrb[2].mxu0  ;;  %v2065_v19 = vpop.f32.mrb[2].mxu1  ;;  %3302 = vmatpush3.bf16.msra.mxu0 %v3858_v9  ;;  %3324 = vmatpush3.bf16.msra.mxu1 %v3881_v10  ;;  %v3362_v47 = vadd.f32 %v1981_v16, %v334_v42  ;;  %v3882_v9 = vld [vmem:[%s5077_s3 + $0x118] sm:$0xff]   ;;  %v3884_v10 = vld [vmem:[%s5077_s3 + $0x160] sm:$0xff]   ;;  %v3892_v16 = vld [vmem:[%s5077_s3 + $0x170] sm:$0xff]  }
 0x13c   :  { %v1984_v22 = vpop.f32.mrb[3].mxu0  ;;  %v2066_v23 = vpop.f32.mrb[3].mxu1  ;;  %3303 = vmatprep.subr.bf16.mxu0 %v3859_v11  ;;  %3325 = vmatprep.subr.bf16.mxu1 %v3883_v13  ;;  %v2396_v57 = vmax.f32 %v3361_v46, 0.0  ;;  %v3886_v11 = vld [vmem:[%s5077_s3 + $0x120] sm:$0xff]   ;;  %v3888_v13 = vld [vmem:[%s5077_s3 + $0x168] sm:$0xff]   ;;  %v3894_v18 = vld [vmem:[%s5077_s3 + $0x130] sm:$0xff]  }
 0x13d   :  { %v2397_v61 = vmax.f32 %v3362_v47, 0.0  ;;  %v3896_v19 = vld [vmem:[%s5077_s3 + $0x178] sm:$0xff]   ;;  %v345_v22 = vsub.s32 4, %v4982_v35  ;;  %v341_v23 = vsub.s32 3, %v4982_v35 }
 0x13f   :  { %3304 = vmatpush3.bf16.msra.mxu0 %v3860_v20  ;;  %3326 = vmatpush3.bf16.msra.mxu1 %v3885_v21  ;;  %v3898_v20 = vld [vmem:[%s5077_s3 + $0x138] sm:$0xff]   ;;  %v337_v21 = vsub.s32 2, %v4982_v35 }
 0x140   :  { %3305 = vmatprep.subr.bf16.mxu0 %v3861_v24  ;;  %3327 = vmatprep.subr.bf16.mxu1 %v3887_v25  ;;  %v349_v24 = vsub.s32 5, %v4982_v35  ;;  %v324_v25 = vld [vmem:[%s5078_s2 + $0x8] sm:$0xf] }
 0x143   :  { %3306 = vmatpush3.bf16.msra.mxu0 %v3862_v26  ;;  %3328 = vmatpush3.bf16.msra.mxu1 %v3889_v32  ;;  %v338_v26 = vrot.slane %v4988_v37, %v337_v21  ;;  %v366_v32 = vrot.slane %v324_v25, %v333_v38 }
 0x144   :  { %3307 = vmatprep.subr.bf16.mxu0 %v3863_v27  ;;  %3329 = vmatprep.subr.bf16.mxu1 %v3891_v5  ;;  %v346_v27 = vrot.slane %v4988_v37, %v345_v22  ;;  %v374_v5 = vrot.slane %v324_v25, %v341_v23 }
 0x147   :  { %3308 = vmatpush3.bf16.msra.mxu0 %v3864_v28  ;;  %3330 = vmatpush3.bf16.msra.mxu1 %v3893_v33  ;;  %v342_v28 = vrot.slane %v4988_v37, %v341_v23  ;;  %v3363_v33 = vadd.f32 %v4933_v15, %v338_v26 }
 0x148   :  { %3309 = vmatprep.subr.bf16.mxu0 %v3865_v29  ;;  %3331 = vmatprep.subr.bf16.mxu1 %v3895_v34  ;;  %v350_v29 = vrot.slane %v4988_v37, %v349_v24 }
 0x149   :  { %v2398_v38 = vmax.f32 %v3363_v33, 0.0 }
 0x14b   :  { %3310 = vmatpush3.bf16.msra.mxu0 %v3866_v30  ;;  %3332 = vmatpush3.bf16.msra.mxu1 %v3897_v48  ;;  %v362_v30 = vrot.slane %v324_v25, %v329_v36  ;;  %v3364_v48 = vadd.f32 %v4935_v17, %v342_v28 }
 0x14c   :  { %3339 = vmatprep.subr.bf16.mxu0 %v3868_v31  ;;  %v370_v31 = vrot.slane %v324_v25, %v337_v21 }
 0x19d   :  { %v5001_v49 = vpop.f32.mrb[4].mxu0  ;;  %v2225_v50 = vpop.f32.mrb[4].mxu1 }
 0x19e   :  { %v3367_v51 = vadd.f32 %v2225_v50, %v354_v44  ;;  %v5003_v52 = vpop.f32.mrb[5].mxu0  ;;  %v2227_v53 = vpop.f32.mrb[5].mxu1  ;;  %v3365_v34 = vadd.f32 %v5001_v49, %v346_v27 }
 0x19f   :  { %v3368_v54 = vadd.f32 %v2227_v53, %v358_v45  ;;  %v2147_v55 = vpop.f32.mrb[6].mxu0  ;;  %v2229_v56 = vpop.f32.mrb[6].mxu1  ;;  %v3366_v12 = vadd.f32 %v5003_v52, %v350_v29  ;;  %v2399_v53 = vmax.f32 %v3364_v48, 0.0 }
 0x1a0   :  { %v2402_v58 = vmax.f32 %v3367_v51, 0.0  ;;  %v2148_v59 = vpop.f32.mrb[7].mxu0  ;;  %v2230_v60 = vpop.f32.mrb[7].mxu1  ;;  %v2400_v47 = vmax.f32 %v3365_v34, 0.0 }
 0x1a1   :  { %v2403_v62 = vmax.f32 %v3368_v54, 0.0  ;;  %v2401_v17 = vmax.f32 %v3366_v12, 0.0 }
 0x1a2   :  { %v2408_v63 = vmax.f32 %v2396_v57, %v2402_v58 }
 0x1a3   :  { %v2409_v0 = vmax.f32 %v2397_v61, %v2403_v62 }
 0x1a4   :  { %v2414_v3 = vpack.c.bf16 %v2408_v63, %v2408_v63 }
 0x1a5   :  { %v2415_v1 = vpack.c.bf16 %v2409_v0, %v2409_v0 }
 0x1a7   :  { %2843 = vmatprep.mubr.bf16.mxu0 %v2415_v1 }
 0x1a8   :  { %2844 = vmatmul.mubr.bf16.vlgmr.msra.gmra.mrb[12].mxu0 %v2414_v3 }
 0x1a9   :  { %3340 = vmatpush3.bf16.msra.mxu0 %v3870_v2 }
 0x1aa   :  { %3341 = vmatprep.subr.bf16.mxu0 %v3872_v43  ;;  %v3246_v43 = vld [vmem:[%s5079_s4] ss:$0 sm:$0xff] }
 0x1ad   :  { %3342 = vmatpush3.bf16.msra.mxu0 %v3874_v4 }
 0x1ae   :  { %3343 = vmatprep.subr.bf16.mxu0 %v3876_v6 }
 0x1b1   :  { %3344 = vmatpush3.bf16.msra.mxu0 %v3878_v7 }
 0x1b2   :  { %3345 = vmatprep.subr.bf16.mxu0 %v3880_v8 }
 0x1b5   :  { %3346 = vmatpush3.bf16.msra.mxu0 %v3882_v9 }
 0x1b6   :  { %3347 = vmatprep.subr.bf16.mxu0 %v3884_v10 }
 0x1b9   :  { %3348 = vmatpush3.bf16.msra.mxu0 %v3886_v11 }
 0x1ba   :  { %3349 = vmatprep.subr.bf16.mxu0 %v3888_v13 }
 0x1bd   :  { %3350 = vmatpush3.bf16.msra.mxu0 %v3890_v14 }
 0x1be   :  { %3351 = vmatprep.subr.bf16.mxu0 %v3892_v16 }
 0x1c1   :  { %3352 = vmatpush3.bf16.msra.mxu0 %v3894_v18 }
 0x1c2   :  { %3353 = vmatprep.subr.bf16.mxu0 %v3896_v19 }
 0x1c5   :  { %3354 = vmatpush3.bf16.msra.mxu0 %v3898_v20 }
 0x201   :  { %v2307_v39 = vpop.f32.mrb[8].mxu0  ;;  %v2389_v40 = vpop.f32.mrb[8].mxu1 }
 0x202   :  { %v3369_v41 = vadd.f32 %v2307_v39, %v362_v30  ;;  %v3371_v37 = vadd.f32 %v2389_v40, %v370_v31  ;;  %v2309_v42 = vpop.f32.mrb[9].mxu0  ;;  %v2391_v44 = vpop.f32.mrb[9].mxu1 }
 0x203   :  { %v3370_v36 = vadd.f32 %v2309_v42, %v366_v32  ;;  %v3372_v45 = vadd.f32 %v2391_v44, %v374_v5  ;;  %v2311_v46 = vpop.f32.mrb[10].mxu0  ;;  %v2393_v35 = vpop.f32.mrb[10].mxu1 }
 0x204   :  { %v2404_v50 = vmax.f32 %v3369_v41, 0.0  ;;  %v2406_v15 = vmax.f32 %v3371_v37, 0.0  ;;  %v2312_v51 = vpop.f32.mrb[11].mxu0  ;;  %v2394_v49 = vpop.f32.mrb[11].mxu1 }
 0x205   :  { %v2405_v54 = vmax.f32 %v3370_v36, 0.0  ;;  %v2407_v52 = vmax.f32 %v3372_v45, 0.0 }
 0x206   :  { %v2410_v55 = vmax.f32 %v2398_v38, %v2404_v50  ;;  %v2412_v56 = vmax.f32 %v2400_v47, %v2406_v15 }
 0x207   :  { %v2411_v57 = vmax.f32 %v2399_v53, %v2405_v54  ;;  %v2413_v58 = vmax.f32 %v2401_v17, %v2407_v52 }
 0x208   :  { %v2416_v61 = vpack.c.bf16 %v2410_v55, %v2410_v55  ;;  %v2418_v62 = vpack.c.bf16 %v2412_v56, %v2412_v56 }
 0x209   :  { %v2417_v59 = vpack.c.bf16 %v2411_v57, %v2411_v57  ;;  %v2419_v60 = vpack.c.bf16 %v2413_v58, %v2413_v58 }
 0x20b   :  { %2883 = vmatprep.mubr.bf16.mxu1 %v2417_v59  ;;  %2923 = vmatprep.mubr.bf16.mxu0 %v2419_v60 }
 0x20c   :  { %2884 = vmatmul.mubr.bf16.vlgmr.msra.gmra.mrb[12].mxu1 %v2416_v61  ;;  %2924 = vmatmul.mubr.bf16.vlgmr.msra.gmra.mrb[16].mxu0 %v2418_v62 }
 0x27b   :  { %v3311_v63 = vpop.f32.mrb[12].mxu0 }
 0x27c   :  { %v3312_v0 = vpop.f32.mrb[13].mxu0 }
 0x27d   :  { %v3313_v1 = vadd.f32 %v3312_v0, %v3311_v63  ;;  %v3314_v2 = vpop.f32.mrb[14].mxu0 }
 0x27e   :  { %v3315_v3 = vpop.f32.mrb[15].mxu0 }
 0x27f   :  { %v2846_v9 = vadd.f32 %v3313_v1, %v3246_v43 }
 0x2df   :  { %v3333_v4 = vpop.f32.mrb[12].mxu1  ;;  %v3355_v6 = vpop.f32.mrb[16].mxu0 }
 0x2e0   :  { %v3334_v7 = vpop.f32.mrb[13].mxu1  ;;  %v3356_v8 = vpop.f32.mrb[17].mxu0 }
 0x2e1   :  { %v3335_v10 = vadd.f32 %v3334_v7, %v3333_v4  ;;  %v3357_v11 = vadd.f32 %v3356_v8, %v3355_v6  ;;  %v3336_v13 = vpop.f32.mrb[14].mxu1  ;;  %v3358_v14 = vpop.f32.mrb[18].mxu0 }
 0x2e2   :  { %v3337_v16 = vpop.f32.mrb[15].mxu1  ;;  %v3359_v18 = vpop.f32.mrb[19].mxu0 }
 0x2e3   :  { %v2886_v19 = vadd.f32 %v3335_v10, %v2846_v9 }
 0x2e5   :  { %v2926_v20 = vadd.f32 %v3357_v11, %v2886_v19 }
 0x2e7   :  { %2931 = vst [vmem:[%s5080_s5] sm:$0xff] %v2926_v20 }

</bundles_post_ra>
